<compile_context>
chip_gen: v7x
topology: tpu7x:2x2x1
jax: 0.10.0
libtpu: 0.0.40
codegen_flags: <defaults>
</compile_context>

<pallas_src>
import math

import jax
import jax.numpy as jnp
from jax import lax
from jax.experimental import pallas as pl
from jax.experimental.pallas import tpu as pltpu


# ----------------------------------------------------------------------------
# small helpers
# ----------------------------------------------------------------------------
_VMEM_LIMIT = 32 * 1024 * 1024  # safe on v5e/v6e (128 MiB) and v7x (64 MiB)


def _cparams(sem):
    return pltpu.CompilerParams(dimension_semantics=sem,
                                vmem_limit_bytes=_VMEM_LIMIT)


def _pick_tile(dim, candidates):
    for c in candidates:
        if dim % c == 0:
            return c
    return dim  # full dim (always legal as a block size)


def _ln(x, g, b):
    # row-wise LayerNorm, f32 (torch nn.LayerNorm, eps=1e-5)
    mu = jnp.mean(x, axis=-1, keepdims=True)
    var = jnp.mean(jnp.square(x - mu), axis=-1, keepdims=True)
    return (x - mu) * lax.rsqrt(var + 1e-5) * g + b


def _time_shift(x):
    # ZeroPad2d((0,0,1,-1)) on the (T, C) view: xx[t] = x[t-1], xx[0] = 0.
    # (kept as a concat for robustness; pltpu.roll+mask is an XLU alternative)
    return jnp.concatenate([jnp.zeros_like(x[:1, :]), x[:-1, :]], axis=0)


# ----------------------------------------------------------------------------
# Kernels
# ----------------------------------------------------------------------------
def _ln_kernel(x_ref, ln_ref, o_ref):
    # x: (T, C) f32 ; ln packed (2, C) = [gamma; beta]
    o_ref[...] = _ln(x_ref[...], ln_ref[0:1, :], ln_ref[1:2, :])


def _tm_front_kernel(x_ref, ln1_ref, wshort_ref, wtop_ref, wbot_ref,
                     short_ref, k_ref, v_ref, sr_ref):
    # x: (T, C) f32 residual stream (post-ln0 for layer 0)
    x = x_ref[...]
    C = x.shape[1]

    # "short" path uses the pre-LN1 residual stream
    short_ref[...] = jnp.maximum(
        jnp.dot(x.astype(jnp.bfloat16), wshort_ref[...],
                preferred_element_type=jnp.float32), 0.0)

    xln = _ln(x, ln1_ref[0:1, :], ln1_ref[1:2, :])
    xx = _time_shift(xln)

    # k|v|r in ONE wide matmul pair: time-mix coefficients are folded into the
    # pre-transposed bf16 weights (Wtop acts on x, Wbot on time-shifted x).
    kvr = (jnp.dot(xln.astype(jnp.bfloat16), wtop_ref[...],
                   preferred_element_type=jnp.float32)
           + jnp.dot(xx.astype(jnp.bfloat16), wbot_ref[...],
                     preferred_element_type=jnp.float32))

    k_ref[...] = kvr[:, 0:C]
    v_ref[...] = kvr[:, C:2 * C]
    sr_ref[...] = jax.nn.sigmoid(kvr[:, 2 * C:3 * C])


def _wkv_kernel(w_ref, u_ref, k_ref, v_ref, y_ref):
    # Exact port of wkv_cuda.forward (log-sum-exp stabilized EMA over time).
    # Refs per grid step: w/u (1, c) f32 ; k/v/y (T, c) f32 (batch squeezed).
    T = k_ref.shape[0]
    c = k_ref.shape[1]
    w = -jnp.exp(w_ref[...])          # (1, c)
    u = u_ref[...]                    # (1, c)

    def body(t, carry):
        p, q, o = carry               # each (1, c) f32
        kt = k_ref[pl.ds(t, 1), :]
        vt = v_ref[pl.ds(t, 1), :]
        no = jnp.maximum(o, u + kt)
        A = jnp.exp(o - no)
        Bc = jnp.exp(u + kt - no)
        y_ref[pl.ds(t, 1), :] = (A * p + Bc * vt) * pl.reciprocal(
            A * q + Bc, approx=True)
        no2 = jnp.maximum(w + o, kt)
        A2 = jnp.exp(w + o - no2)
        B2 = jnp.exp(kt - no2)
        return (A2 * p + B2 * vt, A2 * q + B2, no2)

    p0 = jnp.zeros((1, c), jnp.float32)
    q0 = jnp.zeros((1, c), jnp.float32)
    o0 = jnp.full((1, c), -1e38, jnp.float32)
    _ = lax.fori_loop(0, T, body, (p0, q0, o0))


def _tm_tail_cm_kernel(x_ref, sr_ref, y_ref, short_ref, ln2_ref,
                       wo_ref, wtopf_ref, wbotf_ref, wval_ref, out_ref):
    # time-mix epilogue: sigmoid(r) * wkv -> output projection -> residual
    rwkv = sr_ref[...] * y_ref[...]
    att = jnp.dot(rwkv.astype(jnp.bfloat16), wo_ref[...],
                  preferred_element_type=jnp.float32)
    x1 = x_ref[...] + att

    # channel-mix: LN2 + shift-mix + fused {key|receptance} projection
    xln = _ln(x1, ln2_ref[0:1, :], ln2_ref[1:2, :])
    xx = _time_shift(xln)
    kr = (jnp.dot(xln.astype(jnp.bfloat16), wtopf_ref[...],
                  preferred_element_type=jnp.float32)
          + jnp.dot(xx.astype(jnp.bfloat16), wbotf_ref[...],
                    preferred_element_type=jnp.float32))
    F = wval_ref.shape[0]
    kact = jnp.square(jnp.maximum(kr[:, :F], 0.0))
    kv = jnp.dot(kact.astype(jnp.bfloat16), wval_ref[...],
                 preferred_element_type=jnp.float32)
    ffn = jax.nn.sigmoid(kr[:, F:]) * kv

    out_ref[...] = x1 + ffn + short_ref[...]


def _head_kernel(x_ref, ln_ref, w_ref, o_ref):
    # fused ln_out + head matmul on an (tm, K) x (K, tn) tile
    xln = _ln(x_ref[...], ln_ref[0:1, :], ln_ref[1:2, :])
    o_ref[...] = jnp.dot(xln.astype(jnp.bfloat16), w_ref[...],
                         preferred_element_type=jnp.float32)


# ----------------------------------------------------------------------------
# pallas_call wrappers
# ----------------------------------------------------------------------------
def ln_apply(x, ln_packed):
    B, T, C = x.shape
    act = pl.BlockSpec((None, T, C), lambda b: (b, 0, 0))
    return pl.pallas_call(
        _ln_kernel,
        out_shape=jax.ShapeDtypeStruct((B, T, C), jnp.float32),
        grid=(B,),
        in_specs=[act, pl.BlockSpec((2, C), lambda b: (0, 0))],
        out_specs=act,
        compiler_params=_cparams(("parallel",)),
    )(x, ln_packed)


def tm_front(x, pb):
    B, T, C = x.shape
    act = pl.BlockSpec((None, T, C), lambda b: (b, 0, 0))
    out_shape = tuple(jax.ShapeDtypeStruct((B, T, C), jnp.float32)
                      for _ in range(4))
    return pl.pallas_call(
        _tm_front_kernel,
        out_shape=out_shape,
        grid=(B,),
        in_specs=[
            act,                                            # x
            pl.BlockSpec((2, C), lambda b: (0, 0)),         # ln1 (gamma,beta)
            pl.BlockSpec((C, C), lambda b: (0, 0)),         # short W^T (bf16)
            pl.BlockSpec((C, 3 * C), lambda b: (0, 0)),     # folded Wtop
            pl.BlockSpec((C, 3 * C), lambda b: (0, 0)),     # folded Wbot
        ],
        out_specs=(act, act, act, act),                     # short, k, v, sr
        compiler_params=_cparams(("parallel",)),
    )(x, pb["ln1"], pb["short_w"], pb["att_wtop"], pb["att_wbot"])


def wkv(time_decay, time_first, k, v):
    B, T, C = k.shape
    c_blk = 128 if C % 128 == 0 else C          # lane-dense channel tiles
    nc = C // c_blk
    wu = pl.BlockSpec((1, c_blk), lambda b, c: (0, c))
    act = pl.BlockSpec((None, T, c_blk), lambda b, c: (b, 0, c))
    return pl.pallas_call(
        _wkv_kernel,
        out_shape=jax.ShapeDtypeStruct((B, T, C), jnp.float32),
        grid=(B, nc),
        in_specs=[wu, wu, act, act],
        out_specs=act,
        compiler_params=_cparams(("parallel", "parallel")),
    )(time_decay, time_first, k, v)


def tm_tail_cm(x, sr, y, short, pb):
    B, T, C = x.shape
    F = pb["ffn_wval"].shape[0]
    act = pl.BlockSpec((None, T, C), lambda b: (b, 0, 0))
    return pl.pallas_call(
        _tm_tail_cm_kernel,
        out_shape=jax.ShapeDtypeStruct((B, T, C), jnp.float32),
        grid=(B,),
        in_specs=[
            act, act, act, act,                             # x, sr, y, short
            pl.BlockSpec((2, C), lambda b: (0, 0)),         # ln2
            pl.BlockSpec((C, C), lambda b: (0, 0)),         # output W^T
            pl.BlockSpec((C, F + C), lambda b: (0, 0)),     # folded ffn Wtop
            pl.BlockSpec((C, F + C), lambda b: (0, 0)),     # folded ffn Wbot
            pl.BlockSpec((F, C), lambda b: (0, 0)),         # ffn value W^T
        ],
        out_specs=act,
        compiler_params=_cparams(("parallel",)),
    )(x, sr, y, short, pb["ln2"], pb["att_wo"],
      pb["ffn_wtop"], pb["ffn_wbot"], pb["ffn_wval"])


def head_forward(x, ln_packed, w_t):
    B, T, C = x.shape
    N = w_t.shape[1]
    M = B * T
    x2 = x.reshape(M, C)
    tm = _pick_tile(M, (512, 256, 128, 64, 32, 16, 8))
    tn = _pick_tile(N, (512, 256, 128))
    out = pl.pallas_call(
        _head_kernel,
        out_shape=jax.ShapeDtypeStruct((M, N), jnp.float32),
        grid=(M // tm, N // tn),
        in_specs=[
            pl.BlockSpec((tm, C), lambda i, j: (i, 0)),
            pl.BlockSpec((2, C), lambda i, j: (0, 0)),
            pl.BlockSpec((C, tn), lambda i, j: (0, j)),
        ],
        out_specs=pl.BlockSpec((tm, tn), lambda i, j: (i, j)),
        compiler_params=_cparams(("parallel", "parallel")),
    )(x2, ln_packed, w_t)
    return out.reshape(B, T, N)


# ----------------------------------------------------------------------------
# Model forward (train path): 3 pallas_calls per block + ln0 + fused head
# ----------------------------------------------------------------------------
def point_rwkv_forward(prep, input_token):
    tok = jnp.squeeze(input_token, axis=1)            # (B, 1, T) -> (B, T)
    x = jnp.take(prep["emb"], tok, axis=0)            # embedding lookup (glue)
    for lid, pb in enumerate(prep["blocks"]):
        if lid == 0:
            x = ln_apply(x, pb["ln0"])
        short, k, v, sr = tm_front(x, pb)
        y = wkv(pb["time_decay"], pb["time_first"], k, v)
        x = tm_tail_cm(x, sr, y, short, pb)           # + att / + ffn / + short
    return head_forward(x, prep["ln_out"], prep["head_w"])   # (B, T, vocab)


# ----------------------------------------------------------------------------
# Parameter preparation: one-time pre-transpose / bf16 cast / time-mix folding
# ----------------------------------------------------------------------------
def _pack_ln(g, b):
    return jnp.stack([g, b], axis=0).astype(jnp.float32)      # (2, C)


def prepare_params(params):
    prep = {
        "emb": params["emb"].astype(jnp.float32),
        "ln_out": _pack_ln(params["ln_out_g"], params["ln_out_b"]),
        "head_w": jnp.transpose(params["head_w"]).astype(jnp.bfloat16),
        "blocks": [],
    }
    for bp in params["blocks"]:
        att, ffn = bp["att"], bp["ffn"]
        wk_t = jnp.transpose(att["key_w"]).astype(jnp.float32)
        wv_t = jnp.transpose(att["value_w"]).astype(jnp.float32)
        wr_t = jnp.transpose(att["recept_w"]).astype(jnp.float32)
        mk, mv, mr = att["time_mix_k"], att["time_mix_v"], att["time_mix_r"]
        att_wtop = jnp.concatenate(
            [mk[:, None] * wk_t, mv[:, None] * wv_t, mr[:, None] * wr_t], 1)
        att_wbot = jnp.concatenate(
            [(1 - mk)[:, None] * wk_t, (1 - mv)[:, None] * wv_t,
             (1 - mr)[:, None] * wr_t], 1)

        fwk_t = jnp.transpose(ffn["key_w"]).astype(jnp.float32)    # (C, F)
        fwr_t = jnp.transpose(ffn["recept_w"]).astype(jnp.float32) # (C, C)
        fmk, fmr = ffn["time_mix_k"], ffn["time_mix_r"]
        ffn_wtop = jnp.concatenate(
            [fmk[:, None] * fwk_t, fmr[:, None] * fwr_t], 1)
        ffn_wbot = jnp.concatenate(
            [(1 - fmk)[:, None] * fwk_t, (1 - fmr)[:, None] * fwr_t], 1)

        prep["blocks"].append({
            "ln0": _pack_ln(bp["ln0_g"], bp["ln0_b"]),
            "ln1": _pack_ln(bp["ln1_g"], bp["ln1_b"]),
            "ln2": _pack_ln(bp["ln2_g"], bp["ln2_b"]),
            "short_w": jnp.transpose(bp["short_w"]).astype(jnp.bfloat16),
            "att_wtop": att_wtop.astype(jnp.bfloat16),
            "att_wbot": att_wbot.astype(jnp.bfloat16),
            "att_wo": jnp.transpose(att["output_w"]).astype(jnp.bfloat16),
            "time_decay": att["time_decay"].reshape(1, -1).astype(jnp.float32),
            "time_first": att["time_first"].reshape(1, -1).astype(jnp.float32),
            "ffn_wtop": ffn_wtop.astype(jnp.bfloat16),
            "ffn_wbot": ffn_wbot.astype(jnp.bfloat16),
            "ffn_wval": jnp.transpose(ffn["value_w"]).astype(jnp.bfloat16),
        })
    return prep


# ----------------------------------------------------------------------------
# Deterministic parameter initialization (canonical PyTorch-like layout)
# ----------------------------------------------------------------------------
def init_params(key, vocab, hidden, n_layer, inter):
    keys = iter(jax.random.split(key, 8 * n_layer + 4))

    def lin(out_f, in_f, std=0.02):
        return jax.random.normal(next(keys), (out_f, in_f), jnp.float32) * std

    h = jnp.arange(hidden, dtype=jnp.float32)
    xpos = h / hidden

    params = {
        "emb": jax.random.normal(next(keys), (vocab, hidden), jnp.float32) * 1e-4,
        "ln_out_g": jnp.ones(hidden, jnp.float32),
        "ln_out_b": jnp.zeros(hidden, jnp.float32),
        "head_w": lin(vocab, hidden),
        "blocks": [],
    }

    for lid in range(n_layer):
        ratio_0_to_1 = lid / (n_layer - 1)
        ratio_1_to_almost0 = 1.0 - lid / n_layer
        decay_speed = -5.0 + 8.0 * (h / (hidden - 1)) ** (0.7 + 1.3 * ratio_0_to_1)
        zigzag = (((jnp.arange(hidden) + 1) % 3) - 1).astype(jnp.float32) * 0.5
        time_first = jnp.full((hidden,), math.log(0.3), jnp.float32) + zigzag

        att = {
            "time_decay": decay_speed,
            "time_first": time_first,
            "time_mix_k": xpos ** ratio_1_to_almost0,
            "time_mix_v": xpos ** ratio_1_to_almost0 + 0.3 * ratio_0_to_1,
            "time_mix_r": xpos ** (0.5 * ratio_1_to_almost0),
            "key_w": lin(hidden, hidden),
            "value_w": lin(hidden, hidden),
            "recept_w": lin(hidden, hidden),
            "output_w": lin(hidden, hidden),
        }
        ffn = {
            "time_mix_k": xpos ** ratio_1_to_almost0,
            "time_mix_r": xpos ** ratio_1_to_almost0,
            "key_w": lin(inter, hidden),
            "recept_w": lin(hidden, hidden),
            "value_w": lin(hidden, inter),
        }
        params["blocks"].append({
            "ln0_g": jnp.ones(hidden, jnp.float32),
            "ln0_b": jnp.zeros(hidden, jnp.float32),
            "ln1_g": jnp.ones(hidden, jnp.float32),
            "ln1_b": jnp.zeros(hidden, jnp.float32),
            "ln2_g": jnp.ones(hidden, jnp.float32),
            "ln2_b": jnp.zeros(hidden, jnp.float32),
            "short_w": lin(hidden, hidden),
            "att": att,
            "ffn": ffn,
        })
    return params


# ----------------------------------------------------------------------------
if __name__ == "__main__":
    vocab_size = 64
    hidden_size = 32
    num_hidden_layers = 2
    intermediate_size = 64
    B, T = 2, 8

    key = jax.random.PRNGKey(0)
    pkey, tkey = jax.random.split(key)
    params = init_params(pkey, vocab_size, hidden_size, num_hidden_layers,
                         intermediate_size)
    prep = prepare_params(params)
    input_token = jax.random.randint(tkey, (B, 1, T), 0, vocab_size,
                                     dtype=jnp.int32)

    fwd = jax.jit(point_rwkv_forward)
    logits = fwd(prep, input_token)
    logits = jax.block_until_ready(logits)
    assert logits.shape == (B, T, vocab_size), logits.shape
    assert bool(jnp.all(jnp.isfinite(logits)))
    print("KERNEL_OK")
</pallas_src>

<mosaic_0001>
module attributes {stable_mosaic.version = 11 : i64} {
  func.func @_tm_tail_cm_kernel(%arg0: i32, %arg1: memref<1x8x32xf32, #tpu.memory_space<vmem>>, %arg2: memref<1x8x32xf32, #tpu.memory_space<vmem>>, %arg3: memref<1x8x32xf32, #tpu.memory_space<vmem>>, %arg4: memref<1x8x32xf32, #tpu.memory_space<vmem>>, %arg5: memref<2x32xf32, #tpu.memory_space<vmem>>, %arg6: memref<32x32xbf16, #tpu.memory_space<vmem>>, %arg7: memref<32x96xbf16, #tpu.memory_space<vmem>>, %arg8: memref<32x96xbf16, #tpu.memory_space<vmem>>, %arg9: memref<64x32xbf16, #tpu.memory_space<vmem>>, %arg10: memref<1x8x32xf32, #tpu.memory_space<vmem>>) attributes {dimension_semantics = [#tpu.dimension_semantics<parallel>], iteration_bounds = array<i64: 2>, scalar_prefetch = 0 : i64, scratch_operands = 0 : i64, tpu.core_type = #tpu.core_type<tc>, window_params = [{transform_indices = @transform_0, window_bounds = array<i64: 1, 8, 32>}, {transform_indices = @transform_1, window_bounds = array<i64: 1, 8, 32>}, {transform_indices = @transform_2, window_bounds = array<i64: 1, 8, 32>}, {transform_indices = @transform_3, window_bounds = array<i64: 1, 8, 32>}, {pipeline_mode = #tpu.pipeline_mode<synchronous>, transform_indices = @transform_4, window_bounds = array<i64: 2, 32>}, {pipeline_mode = #tpu.pipeline_mode<synchronous>, transform_indices = @transform_5, window_bounds = array<i64: 32, 32>}, {pipeline_mode = #tpu.pipeline_mode<synchronous>, transform_indices = @transform_6, window_bounds = array<i64: 32, 96>}, {pipeline_mode = #tpu.pipeline_mode<synchronous>, transform_indices = @transform_7, window_bounds = array<i64: 32, 96>}, {pipeline_mode = #tpu.pipeline_mode<synchronous>, transform_indices = @transform_8, window_bounds = array<i64: 64, 32>}, {transform_indices = @transform_9, window_bounds = array<i64: 1, 8, 32>}]} {
    %c0 = arith.constant 0 : index
    %c0_0 = arith.constant 0 : index
    %c0_1 = arith.constant 0 : index
    %0 = vector.load %arg2[%c0, %c0_0, %c0_1] : memref<1x8x32xf32, #tpu.memory_space<vmem>>, vector<1x8x32xf32>
    %1 = vector.shape_cast %0 : vector<1x8x32xf32> to vector<8x32xf32>
    %c0_2 = arith.constant 0 : index
    %c0_3 = arith.constant 0 : index
    %c0_4 = arith.constant 0 : index
    %2 = vector.load %arg3[%c0_2, %c0_3, %c0_4] : memref<1x8x32xf32, #tpu.memory_space<vmem>>, vector<1x8x32xf32>
    %3 = vector.shape_cast %2 : vector<1x8x32xf32> to vector<8x32xf32>
    %4 = arith.mulf %1, %3 : vector<8x32xf32>
    %5 = arith.truncf %4 : vector<8x32xf32> to vector<8x32xbf16>
    %c0_5 = arith.constant 0 : index
    %c0_6 = arith.constant 0 : index
    %6 = vector.load %arg6[%c0_5, %c0_6] : memref<32x32xbf16, #tpu.memory_space<vmem>>, vector<32x32xbf16>
    %cst = arith.constant dense<0.000000e+00> : vector<8x32xf32>
    %7 = tpu.matmul %5, %6, %cst {dimension_numbers = #tpu.dot_dimension_numbers<[1], [0], [0], [1], [0, 0, 1, 1], [], []>} : vector<8x32xbf16>, vector<32x32xbf16>, vector<8x32xf32> -> vector<8x32xf32>
    %c0_7 = arith.constant 0 : index
    %c0_8 = arith.constant 0 : index
    %c0_9 = arith.constant 0 : index
    %8 = vector.load %arg1[%c0_7, %c0_8, %c0_9] : memref<1x8x32xf32, #tpu.memory_space<vmem>>, vector<1x8x32xf32>
    %9 = vector.shape_cast %8 : vector<1x8x32xf32> to vector<8x32xf32>
    %10 = arith.addf %9, %7 : vector<8x32xf32>
    %c0_10 = arith.constant 0 : index
    %c0_11 = arith.constant 0 : index
    %11 = vector.load %arg5[%c0_10, %c0_11] : memref<2x32xf32, #tpu.memory_space<vmem>>, vector<1x32xf32>
    %c1 = arith.constant 1 : index
    %c0_12 = arith.constant 0 : index
    %12 = vector.load %arg5[%c1, %c0_12] : memref<2x32xf32, #tpu.memory_space<vmem>>, vector<1x32xf32>
    %cst_13 = arith.constant dense<0.000000e+00> : vector<8xf32>
    %13 = vector.multi_reduction <add>, %10, %cst_13 [1] : vector<8x32xf32> to vector<8xf32>
    %14 = vector.shape_cast %13 : vector<8xf32> to vector<8x1xf32>
    %cst_14 = arith.constant 3.200000e+01 : f32
    %15 = vector.broadcast %cst_14 : f32 to vector<8x1xf32>
    %16 = arith.divf %14, %15 : vector<8x1xf32>
    %17 = vector.broadcast %16 : vector<8x1xf32> to vector<8x32xf32>
    %18 = arith.subf %10, %17 : vector<8x32xf32>
    %19 = arith.mulf %18, %18 : vector<8x32xf32>
    %cst_15 = arith.constant dense<0.000000e+00> : vector<8xf32>
    %20 = vector.multi_reduction <add>, %19, %cst_15 [1] : vector<8x32xf32> to vector<8xf32>
    %21 = vector.shape_cast %20 : vector<8xf32> to vector<8x1xf32>
    %cst_16 = arith.constant 3.200000e+01 : f32
    %22 = vector.broadcast %cst_16 : f32 to vector<8x1xf32>
    %23 = arith.divf %21, %22 : vector<8x1xf32>
    %24 = vector.broadcast %16 : vector<8x1xf32> to vector<8x32xf32>
    %25 = arith.subf %10, %24 : vector<8x32xf32>
    %cst_17 = arith.constant 9.99999974E-6 : f32
    %26 = vector.broadcast %cst_17 : f32 to vector<8x1xf32>
    %27 = arith.addf %23, %26 : vector<8x1xf32>
    %28 = math.rsqrt %27 : vector<8x1xf32>
    %29 = vector.broadcast %28 : vector<8x1xf32> to vector<8x32xf32>
    %30 = arith.mulf %25, %29 : vector<8x32xf32>
    %31 = vector.broadcast %11 : vector<1x32xf32> to vector<8x32xf32>
    %32 = arith.mulf %30, %31 : vector<8x32xf32>
    %33 = vector.broadcast %12 : vector<1x32xf32> to vector<8x32xf32>
    %34 = arith.addf %32, %33 : vector<8x32xf32>
    %cst_18 = arith.constant 0.000000e+00 : f32
    %35 = vector.broadcast %cst_18 : f32 to vector<1x32xf32>
    %36 = vector.extract_strided_slice %34 {offsets = [0, 0], sizes = [7, 32], strides = [1, 1]} : vector<8x32xf32> to vector<7x32xf32>
    %37 = tpu.concatenate %35, %36 in 0 : vector<1x32xf32>, vector<7x32xf32> -> vector<8x32xf32>
    %38 = arith.truncf %34 : vector<8x32xf32> to vector<8x32xbf16>
    %c0_19 = arith.constant 0 : index
    %c0_20 = arith.constant 0 : index
    %39 = vector.load %arg7[%c0_19, %c0_20] : memref<32x96xbf16, #tpu.memory_space<vmem>>, vector<32x96xbf16>
    %cst_21 = arith.constant dense<0.000000e+00> : vector<8x96xf32>
    %40 = tpu.matmul %38, %39, %cst_21 {dimension_numbers = #tpu.dot_dimension_numbers<[1], [0], [0], [1], [0, 0, 1, 1], [], []>} : vector<8x32xbf16>, vector<32x96xbf16>, vector<8x96xf32> -> vector<8x96xf32>
    %41 = arith.truncf %37 : vector<8x32xf32> to vector<8x32xbf16>
    %c0_22 = arith.constant 0 : index
    %c0_23 = arith.constant 0 : index
    %42 = vector.load %arg8[%c0_22, %c0_23] : memref<32x96xbf16, #tpu.memory_space<vmem>>, vector<32x96xbf16>
    %cst_24 = arith.constant dense<0.000000e+00> : vector<8x96xf32>
    %43 = tpu.matmul %41, %42, %cst_24 {dimension_numbers = #tpu.dot_dimension_numbers<[1], [0], [0], [1], [0, 0, 1, 1], [], []>} : vector<8x32xbf16>, vector<32x96xbf16>, vector<8x96xf32> -> vector<8x96xf32>
    %44 = arith.addf %40, %43 : vector<8x96xf32>
    %45 = vector.extract_strided_slice %44 {offsets = [0, 0], sizes = [8, 64], strides = [1, 1]} : vector<8x96xf32> to vector<8x64xf32>
    %cst_25 = arith.constant 0.000000e+00 : f32
    %46 = vector.broadcast %cst_25 : f32 to vector<8x64xf32>
    %47 = arith.maximumf %45, %46 : vector<8x64xf32>
    %48 = arith.mulf %47, %47 : vector<8x64xf32>
    %49 = arith.truncf %48 : vector<8x64xf32> to vector<8x64xbf16>
    %c0_26 = arith.constant 0 : index
    %c0_27 = arith.constant 0 : index
    %50 = vector.load %arg9[%c0_26, %c0_27] : memref<64x32xbf16, #tpu.memory_space<vmem>>, vector<64x32xbf16>
    %cst_28 = arith.constant dense<0.000000e+00> : vector<8x32xf32>
    %51 = tpu.matmul %49, %50, %cst_28 {dimension_numbers = #tpu.dot_dimension_numbers<[1], [0], [0], [1], [0, 0, 1, 1], [], []>} : vector<8x64xbf16>, vector<64x32xbf16>, vector<8x32xf32> -> vector<8x32xf32>
    %52 = vector.extract_strided_slice %44 {offsets = [0, 64], sizes = [8, 32], strides = [1, 1]} : vector<8x96xf32> to vector<8x32xf32>
    %53 = arith.negf %52 : vector<8x32xf32>
    %54 = math.exp %53 : vector<8x32xf32>
    %cst_29 = arith.constant 1.000000e+00 : f32
    %55 = vector.broadcast %cst_29 : f32 to vector<8x32xf32>
    %56 = arith.addf %55, %54 : vector<8x32xf32>
    %57 = arith.divf %55, %56 : vector<8x32xf32>
    %58 = arith.mulf %57, %51 : vector<8x32xf32>
    %59 = arith.addf %10, %58 : vector<8x32xf32>
    %c0_30 = arith.constant 0 : index
    %c0_31 = arith.constant 0 : index
    %c0_32 = arith.constant 0 : index
    %60 = vector.load %arg4[%c0_30, %c0_31, %c0_32] : memref<1x8x32xf32, #tpu.memory_space<vmem>>, vector<1x8x32xf32>
    %61 = vector.shape_cast %60 : vector<1x8x32xf32> to vector<8x32xf32>
    %62 = arith.addf %59, %61 : vector<8x32xf32>
    %c0_33 = arith.constant 0 : index
    %c0_34 = arith.constant 0 : index
    %c0_35 = arith.constant 0 : index
    %63 = vector.load %arg10[%c0_33, %c0_34, %c0_35] : memref<1x8x32xf32, #tpu.memory_space<vmem>>, vector<1x8x32xf32>
    %64 = vector.shape_cast %63 : vector<1x8x32xf32> to vector<8x32xf32>
    %65 = vector.shape_cast %62 : vector<8x32xf32> to vector<1x8x32xf32>
    tpu.vector_store %arg10[%c0_33, %c0_34, %c0_35], %65 {strides = array<i32>} : memref<1x8x32xf32, #tpu.memory_space<vmem>>, vector<1x8x32xf32>,
    return
  }
  func.func @transform_0(%arg0: i32) -> (i32, i32, i32) {
    %c0_i32 = arith.constant 0 : i32
    %c0_i32_0 = arith.constant 0 : i32
    %c0_i32_1 = arith.constant 0 : i32
    return %arg0, %c0_i32, %c0_i32_0 : i32, i32, i32
  }
  func.func @transform_1(%arg0: i32) -> (i32, i32, i32) {
    %c0_i32 = arith.constant 0 : i32
    %c0_i32_0 = arith.constant 0 : i32
    %c0_i32_1 = arith.constant 0 : i32
    return %arg0, %c0_i32, %c0_i32_0 : i32, i32, i32
  }
  func.func @transform_2(%arg0: i32) -> (i32, i32, i32) {
    %c0_i32 = arith.constant 0 : i32
    %c0_i32_0 = arith.constant 0 : i32
    %c0_i32_1 = arith.constant 0 : i32
    return %arg0, %c0_i32, %c0_i32_0 : i32, i32, i32
  }
  func.func @transform_3(%arg0: i32) -> (i32, i32, i32) {
    %c0_i32 = arith.constant 0 : i32
    %c0_i32_0 = arith.constant 0 : i32
    %c0_i32_1 = arith.constant 0 : i32
    return %arg0, %c0_i32, %c0_i32_0 : i32, i32, i32
  }
  func.func @transform_4(%arg0: i32) -> (i32, i32) {
    %c0_i32 = arith.constant 0 : i32
    %c0_i32_0 = arith.constant 0 : i32
    %c0_i32_1 = arith.constant 0 : i32
    return %c0_i32, %c0_i32_0 : i32, i32
  }
  func.func @transform_5(%arg0: i32) -> (i32, i32) {
    %c0_i32 = arith.constant 0 : i32
    %c0_i32_0 = arith.constant 0 : i32
    %c0_i32_1 = arith.constant 0 : i32
    return %c0_i32, %c0_i32_0 : i32, i32
  }
  func.func @transform_6(%arg0: i32) -> (i32, i32) {
    %c0_i32 = arith.constant 0 : i32
    %c0_i32_0 = arith.constant 0 : i32
    %c0_i32_1 = arith.constant 0 : i32
    return %c0_i32, %c0_i32_0 : i32, i32
  }
  func.func @transform_7(%arg0: i32) -> (i32, i32) {
    %c0_i32 = arith.constant 0 : i32
    %c0_i32_0 = arith.constant 0 : i32
    %c0_i32_1 = arith.constant 0 : i32
    return %c0_i32, %c0_i32_0 : i32, i32
  }
  func.func @transform_8(%arg0: i32) -> (i32, i32) {
    %c0_i32 = arith.constant 0 : i32
    %c0_i32_0 = arith.constant 0 : i32
    %c0_i32_1 = arith.constant 0 : i32
    return %c0_i32, %c0_i32_0 : i32, i32
  }
  func.func @transform_9(%arg0: i32) -> (i32, i32, i32) {
    %c0_i32 = arith.constant 0 : i32
    %c0_i32_0 = arith.constant 0 : i32
    %c0_i32_1 = arith.constant 0 : i32
    return %arg0, %c0_i32, %c0_i32_0 : i32, i32, i32
  }
}

module attributes {stable_mosaic.version = 11 : i64} {
  func.func @_ln_kernel(%arg0: i32, %arg1: memref<1x8x32xf32, #tpu.memory_space<vmem>>, %arg2: memref<2x32xf32, #tpu.memory_space<vmem>>, %arg3: memref<1x8x32xf32, #tpu.memory_space<vmem>>) attributes {dimension_semantics = [#tpu.dimension_semantics<parallel>], iteration_bounds = array<i64: 2>, scalar_prefetch = 0 : i64, scratch_operands = 0 : i64, tpu.core_type = #tpu.core_type<tc>, window_params = [{transform_indices = @transform_0, window_bounds = array<i64: 1, 8, 32>}, {pipeline_mode = #tpu.pipeline_mode<synchronous>, transform_indices = @transform_1, window_bounds = array<i64: 2, 32>}, {transform_indices = @transform_2, window_bounds = array<i64: 1, 8, 32>}]} {
    %c0 = arith.constant 0 : index
    %c0_0 = arith.constant 0 : index
    %c0_1 = arith.constant 0 : index
    %0 = vector.load %arg1[%c0, %c0_0, %c0_1] : memref<1x8x32xf32, #tpu.memory_space<vmem>>, vector<1x8x32xf32>
    %1 = vector.shape_cast %0 : vector<1x8x32xf32> to vector<8x32xf32>
    %c0_2 = arith.constant 0 : index
    %c0_3 = arith.constant 0 : index
    %2 = vector.load %arg2[%c0_2, %c0_3] : memref<2x32xf32, #tpu.memory_space<vmem>>, vector<1x32xf32>
    %c1 = arith.constant 1 : index
    %c0_4 = arith.constant 0 : index
    %3 = vector.load %arg2[%c1, %c0_4] : memref<2x32xf32, #tpu.memory_space<vmem>>, vector<1x32xf32>
    %cst = arith.constant dense<0.000000e+00> : vector<8xf32>
    %4 = vector.multi_reduction <add>, %1, %cst [1] : vector<8x32xf32> to vector<8xf32>
    %5 = vector.shape_cast %4 : vector<8xf32> to vector<8x1xf32>
    %cst_5 = arith.constant 3.200000e+01 : f32
    %6 = vector.broadcast %cst_5 : f32 to vector<8x1xf32>
    %7 = arith.divf %5, %6 : vector<8x1xf32>
    %8 = vector.broadcast %7 : vector<8x1xf32> to vector<8x32xf32>
    %9 = arith.subf %1, %8 : vector<8x32xf32>
    %10 = arith.mulf %9, %9 : vector<8x32xf32>
    %cst_6 = arith.constant dense<0.000000e+00> : vector<8xf32>
    %11 = vector.multi_reduction <add>, %10, %cst_6 [1] : vector<8x32xf32> to vector<8xf32>
    %12 = vector.shape_cast %11 : vector<8xf32> to vector<8x1xf32>
    %cst_7 = arith.constant 3.200000e+01 : f32
    %13 = vector.broadcast %cst_7 : f32 to vector<8x1xf32>
    %14 = arith.divf %12, %13 : vector<8x1xf32>
    %15 = vector.broadcast %7 : vector<8x1xf32> to vector<8x32xf32>
    %16 = arith.subf %1, %15 : vector<8x32xf32>
    %cst_8 = arith.constant 9.99999974E-6 : f32
    %17 = vector.broadcast %cst_8 : f32 to vector<8x1xf32>
    %18 = arith.addf %14, %17 : vector<8x1xf32>
    %19 = math.rsqrt %18 : vector<8x1xf32>
    %20 = vector.broadcast %19 : vector<8x1xf32> to vector<8x32xf32>
    %21 = arith.mulf %16, %20 : vector<8x32xf32>
    %22 = vector.broadcast %2 : vector<1x32xf32> to vector<8x32xf32>
    %23 = arith.mulf %21, %22 : vector<8x32xf32>
    %24 = vector.broadcast %3 : vector<1x32xf32> to vector<8x32xf32>
    %25 = arith.addf %23, %24 : vector<8x32xf32>
    %c0_9 = arith.constant 0 : index
    %c0_10 = arith.constant 0 : index
    %c0_11 = arith.constant 0 : index
    %26 = vector.load %arg3[%c0_9, %c0_10, %c0_11] : memref<1x8x32xf32, #tpu.memory_space<vmem>>, vector<1x8x32xf32>
    %27 = vector.shape_cast %26 : vector<1x8x32xf32> to vector<8x32xf32>
    %28 = vector.shape_cast %25 : vector<8x32xf32> to vector<1x8x32xf32>
    tpu.vector_store %arg3[%c0_9, %c0_10, %c0_11], %28 {strides = array<i32>} : memref<1x8x32xf32, #tpu.memory_space<vmem>>, vector<1x8x32xf32>,
    return
  }
  func.func @transform_0(%arg0: i32) -> (i32, i32, i32) {
    %c0_i32 = arith.constant 0 : i32
    %c0_i32_0 = arith.constant 0 : i32
    %c0_i32_1 = arith.constant 0 : i32
    return %arg0, %c0_i32, %c0_i32_0 : i32, i32, i32
  }
  func.func @transform_1(%arg0: i32) -> (i32, i32) {
    %c0_i32 = arith.constant 0 : i32
    %c0_i32_0 = arith.constant 0 : i32
    %c0_i32_1 = arith.constant 0 : i32
    return %c0_i32, %c0_i32_0 : i32, i32
  }
  func.func @transform_2(%arg0: i32) -> (i32, i32, i32) {
    %c0_i32 = arith.constant 0 : i32
    %c0_i32_0 = arith.constant 0 : i32
    %c0_i32_1 = arith.constant 0 : i32
    return %arg0, %c0_i32, %c0_i32_0 : i32, i32, i32
  }
}

module attributes {stable_mosaic.version = 11 : i64} {
  func.func @_wkv_kernel(%arg0: i32, %arg1: i32, %arg2: memref<1x32xf32, #tpu.memory_space<vmem>>, %arg3: memref<1x32xf32, #tpu.memory_space<vmem>>, %arg4: memref<1x8x32xf32, #tpu.memory_space<vmem>>, %arg5: memref<1x8x32xf32, #tpu.memory_space<vmem>>, %arg6: memref<1x8x32xf32, #tpu.memory_space<vmem>>) attributes {dimension_semantics = [#tpu.dimension_semantics<parallel>, #tpu.dimension_semantics<parallel>], iteration_bounds = array<i64: 2, 1>, scalar_prefetch = 0 : i64, scratch_operands = 0 : i64, tpu.core_type = #tpu.core_type<tc>, window_params = [{transform_indices = @transform_0, window_bounds = array<i64: 1, 32>}, {transform_indices = @transform_1, window_bounds = array<i64: 1, 32>}, {transform_indices = @transform_2, window_bounds = array<i64: 1, 8, 32>}, {transform_indices = @transform_3, window_bounds = array<i64: 1, 8, 32>}, {transform_indices = @transform_4, window_bounds = array<i64: 1, 8, 32>}]} {
    %c0 = arith.constant 0 : index
    %c0_0 = arith.constant 0 : index
    %0 = vector.load %arg2[%c0, %c0_0] : memref<1x32xf32, #tpu.memory_space<vmem>>, vector<1x32xf32>
    %1 = math.exp %0 : vector<1x32xf32>
    %cst = arith.constant 0.000000e+00 : f32
    %2 = vector.broadcast %cst : f32 to vector<1x32xf32>
    %3 = arith.subf %2, %1 : vector<1x32xf32>
    %c0_1 = arith.constant 0 : index
    %c0_2 = arith.constant 0 : index
    %4 = vector.load %arg3[%c0_1, %c0_2] : memref<1x32xf32, #tpu.memory_space<vmem>>, vector<1x32xf32>
    %cst_3 = arith.constant 0.000000e+00 : f32
    %5 = vector.broadcast %cst_3 : f32 to vector<1x32xf32>
    %cst_4 = arith.constant 0.000000e+00 : f32
    %6 = vector.broadcast %cst_4 : f32 to vector<1x32xf32>
    %cst_5 = arith.constant -9.99999968E+37 : f32
    %7 = vector.broadcast %cst_5 : f32 to vector<1x32xf32>
    %c0_i32 = arith.constant 0 : i32
    %c8_i32 = arith.constant 8 : i32
    %8 = arith.addi %c0_i32, %c8_i32 : i32
    %c1_i32 = arith.constant 1 : i32
    %9:3 = scf.for %arg7 = %c0_i32 to %8 step %c1_i32 iter_args(%arg8 = %5, %arg9 = %6, %arg10 = %7) -> (vector<1x32xf32>, vector<1x32xf32>, vector<1x32xf32>)  : i32 {
      %c0_7 = arith.constant 0 : index
      %10 = arith.index_cast %arg7 : i32 to index
      %c0_8 = arith.constant 0 : index
      %11 = vector.load %arg4[%c0_7, %10, %c0_8] : memref<1x8x32xf32, #tpu.memory_space<vmem>>, vector<1x1x32xf32>
      %12 = vector.shape_cast %11 : vector<1x1x32xf32> to vector<1x32xf32>
      %c0_9 = arith.constant 0 : index
      %13 = arith.index_cast %arg7 : i32 to index
      %c0_10 = arith.constant 0 : index
      %14 = vector.load %arg5[%c0_9, %13, %c0_10] : memref<1x8x32xf32, #tpu.memory_space<vmem>>, vector<1x1x32xf32>
      %15 = vector.shape_cast %14 : vector<1x1x32xf32> to vector<1x32xf32>
      %16 = arith.addf %4, %12 : vector<1x32xf32>
      %17 = arith.maximumf %arg10, %16 : vector<1x32xf32>
      %18 = arith.subf %arg10, %17 : vector<1x32xf32>
      %19 = math.exp %18 : vector<1x32xf32>
      %20 = arith.addf %4, %12 : vector<1x32xf32>
      %21 = arith.subf %20, %17 : vector<1x32xf32>
      %22 = math.exp %21 : vector<1x32xf32>
      %23 = arith.mulf %19, %arg8 : vector<1x32xf32>
      %24 = arith.mulf %22, %15 : vector<1x32xf32>
      %25 = arith.addf %23, %24 : vector<1x32xf32>
      %26 = arith.mulf %19, %arg9 : vector<1x32xf32>
      %27 = arith.addf %26, %22 : vector<1x32xf32>
      %28 = tpu.reciprocal %27 {approx = true} : vector<1x32xf32> -> vector<1x32xf32>
      %29 = arith.mulf %25, %28 : vector<1x32xf32>
      %c0_11 = arith.constant 0 : index
      %30 = arith.index_cast %arg7 : i32 to index
      %c0_12 = arith.constant 0 : index
      %31 = vector.load %arg6[%c0_11, %30, %c0_12] : memref<1x8x32xf32, #tpu.memory_space<vmem>>, vector<1x1x32xf32>
      %32 = vector.shape_cast %31 : vector<1x1x32xf32> to vector<1x32xf32>
      %33 = vector.shape_cast %29 : vector<1x32xf32> to vector<1x1x32xf32>
      tpu.vector_store %arg6[%c0_11, %30, %c0_12], %33 {strides = array<i32>} : memref<1x8x32xf32, #tpu.memory_space<vmem>>, vector<1x1x32xf32>,
      %34 = arith.addf %3, %arg10 : vector<1x32xf32>
      %35 = arith.maximumf %34, %12 : vector<1x32xf32>
      %36 = arith.addf %3, %arg10 : vector<1x32xf32>
      %37 = arith.subf %36, %35 : vector<1x32xf32>
      %38 = math.exp %37 : vector<1x32xf32>
      %39 = arith.subf %12, %35 : vector<1x32xf32>
      %40 = math.exp %39 : vector<1x32xf32>
      %41 = arith.mulf %38, %arg8 : vector<1x32xf32>
      %42 = arith.mulf %40, %15 : vector<1x32xf32>
      %43 = arith.addf %41, %42 : vector<1x32xf32>
      %44 = arith.mulf %38, %arg9 : vector<1x32xf32>
      %45 = arith.addf %44, %40 : vector<1x32xf32>
      scf.yield %43, %45, %35 : vector<1x32xf32>, vector<1x32xf32>, vector<1x32xf32>
    }
    %c8_i32_6 = arith.constant 8 : i32
    return
  }
  func.func @transform_0(%arg0: i32, %arg1: i32) -> (i32, i32) {
    %c0_i32 = arith.constant 0 : i32
    %c0_i32_0 = arith.constant 0 : i32
    return %c0_i32, %arg1 : i32, i32
  }
  func.func @transform_1(%arg0: i32, %arg1: i32) -> (i32, i32) {
    %c0_i32 = arith.constant 0 : i32
    %c0_i32_0 = arith.constant 0 : i32
    return %c0_i32, %arg1 : i32, i32
  }
  func.func @transform_2(%arg0: i32, %arg1: i32) -> (i32, i32, i32) {
    %c0_i32 = arith.constant 0 : i32
    %c0_i32_0 = arith.constant 0 : i32
    return %arg0, %c0_i32, %arg1 : i32, i32, i32
  }
  func.func @transform_3(%arg0: i32, %arg1: i32) -> (i32, i32, i32) {
    %c0_i32 = arith.constant 0 : i32
    %c0_i32_0 = arith.constant 0 : i32
    return %arg0, %c0_i32, %arg1 : i32, i32, i32
  }
  func.func @transform_4(%arg0: i32, %arg1: i32) -> (i32, i32, i32) {
    %c0_i32 = arith.constant 0 : i32
    %c0_i32_0 = arith.constant 0 : i32
    return %arg0, %c0_i32, %arg1 : i32, i32, i32
  }
}

module attributes {stable_mosaic.version = 11 : i64} {
  func.func @_tm_front_kernel(%arg0: i32, %arg1: memref<1x8x32xf32, #tpu.memory_space<vmem>>, %arg2: memref<2x32xf32, #tpu.memory_space<vmem>>, %arg3: memref<32x32xbf16, #tpu.memory_space<vmem>>, %arg4: memref<32x96xbf16, #tpu.memory_space<vmem>>, %arg5: memref<32x96xbf16, #tpu.memory_space<vmem>>, %arg6: memref<1x8x32xf32, #tpu.memory_space<vmem>>, %arg7: memref<1x8x32xf32, #tpu.memory_space<vmem>>, %arg8: memref<1x8x32xf32, #tpu.memory_space<vmem>>, %arg9: memref<1x8x32xf32, #tpu.memory_space<vmem>>) attributes {dimension_semantics = [#tpu.dimension_semantics<parallel>], iteration_bounds = array<i64: 2>, scalar_prefetch = 0 : i64, scratch_operands = 0 : i64, tpu.core_type = #tpu.core_type<tc>, window_params = [{transform_indices = @transform_0, window_bounds = array<i64: 1, 8, 32>}, {pipeline_mode = #tpu.pipeline_mode<synchronous>, transform_indices = @transform_1, window_bounds = array<i64: 2, 32>}, {pipeline_mode = #tpu.pipeline_mode<synchronous>, transform_indices = @transform_2, window_bounds = array<i64: 32, 32>}, {pipeline_mode = #tpu.pipeline_mode<synchronous>, transform_indices = @transform_3, window_bounds = array<i64: 32, 96>}, {pipeline_mode = #tpu.pipeline_mode<synchronous>, transform_indices = @transform_4, window_bounds = array<i64: 32, 96>}, {transform_indices = @transform_5, window_bounds = array<i64: 1, 8, 32>}, {transform_indices = @transform_6, window_bounds = array<i64: 1, 8, 32>}, {transform_indices = @transform_7, window_bounds = array<i64: 1, 8, 32>}, {transform_indices = @transform_8, window_bounds = array<i64: 1, 8, 32>}]} {
    %c0 = arith.constant 0 : index
    %c0_0 = arith.constant 0 : index
    %c0_1 = arith.constant 0 : index
    %0 = vector.load %arg1[%c0, %c0_0, %c0_1] : memref<1x8x32xf32, #tpu.memory_space<vmem>>, vector<1x8x32xf32>
    %1 = vector.shape_cast %0 : vector<1x8x32xf32> to vector<8x32xf32>
    %2 = arith.truncf %1 : vector<8x32xf32> to vector<8x32xbf16>
    %c0_2 = arith.constant 0 : index
    %c0_3 = arith.constant 0 : index
    %3 = vector.load %arg3[%c0_2, %c0_3] : memref<32x32xbf16, #tpu.memory_space<vmem>>, vector<32x32xbf16>
    %cst = arith.constant dense<0.000000e+00> : vector<8x32xf32>
    %4 = tpu.matmul %2, %3, %cst {dimension_numbers = #tpu.dot_dimension_numbers<[1], [0], [0], [1], [0, 0, 1, 1], [], []>} : vector<8x32xbf16>, vector<32x32xbf16>, vector<8x32xf32> -> vector<8x32xf32>
    %cst_4 = arith.constant 0.000000e+00 : f32
    %5 = vector.broadcast %cst_4 : f32 to vector<8x32xf32>
    %6 = arith.maximumf %4, %5 : vector<8x32xf32>
    %c0_5 = arith.constant 0 : index
    %c0_6 = arith.constant 0 : index
    %c0_7 = arith.constant 0 : index
    %7 = vector.load %arg6[%c0_5, %c0_6, %c0_7] : memref<1x8x32xf32, #tpu.memory_space<vmem>>, vector<1x8x32xf32>
    %8 = vector.shape_cast %7 : vector<1x8x32xf32> to vector<8x32xf32>
    %9 = vector.shape_cast %6 : vector<8x32xf32> to vector<1x8x32xf32>
    tpu.vector_store %arg6[%c0_5, %c0_6, %c0_7], %9 {strides = array<i32>} : memref<1x8x32xf32, #tpu.memory_space<vmem>>, vector<1x8x32xf32>,
    %c0_8 = arith.constant 0 : index
    %c0_9 = arith.constant 0 : index
    %10 = vector.load %arg2[%c0_8, %c0_9] : memref<2x32xf32, #tpu.memory_space<vmem>>, vector<1x32xf32>
    %c1 = arith.constant 1 : index
    %c0_10 = arith.constant 0 : index
    %11 = vector.load %arg2[%c1, %c0_10] : memref<2x32xf32, #tpu.memory_space<vmem>>, vector<1x32xf32>
    %cst_11 = arith.constant dense<0.000000e+00> : vector<8xf32>
    %12 = vector.multi_reduction <add>, %1, %cst_11 [1] : vector<8x32xf32> to vector<8xf32>
    %13 = vector.shape_cast %12 : vector<8xf32> to vector<8x1xf32>
    %cst_12 = arith.constant 3.200000e+01 : f32
    %14 = vector.broadcast %cst_12 : f32 to vector<8x1xf32>
    %15 = arith.divf %13, %14 : vector<8x1xf32>
    %16 = vector.broadcast %15 : vector<8x1xf32> to vector<8x32xf32>
    %17 = arith.subf %1, %16 : vector<8x32xf32>
    %18 = arith.mulf %17, %17 : vector<8x32xf32>
    %cst_13 = arith.constant dense<0.000000e+00> : vector<8xf32>
    %19 = vector.multi_reduction <add>, %18, %cst_13 [1] : vector<8x32xf32> to vector<8xf32>
    %20 = vector.shape_cast %19 : vector<8xf32> to vector<8x1xf32>
    %cst_14 = arith.constant 3.200000e+01 : f32
    %21 = vector.broadcast %cst_14 : f32 to vector<8x1xf32>
    %22 = arith.divf %20, %21 : vector<8x1xf32>
    %23 = vector.broadcast %15 : vector<8x1xf32> to vector<8x32xf32>
    %24 = arith.subf %1, %23 : vector<8x32xf32>
    %cst_15 = arith.constant 9.99999974E-6 : f32
    %25 = vector.broadcast %cst_15 : f32 to vector<8x1xf32>
    %26 = arith.addf %22, %25 : vector<8x1xf32>
    %27 = math.rsqrt %26 : vector<8x1xf32>
    %28 = vector.broadcast %27 : vector<8x1xf32> to vector<8x32xf32>
    %29 = arith.mulf %24, %28 : vector<8x32xf32>
    %30 = vector.broadcast %10 : vector<1x32xf32> to vector<8x32xf32>
    %31 = arith.mulf %29, %30 : vector<8x32xf32>
    %32 = vector.broadcast %11 : vector<1x32xf32> to vector<8x32xf32>
    %33 = arith.addf %31, %32 : vector<8x32xf32>
    %cst_16 = arith.constant 0.000000e+00 : f32
    %34 = vector.broadcast %cst_16 : f32 to vector<1x32xf32>
    %35 = vector.extract_strided_slice %33 {offsets = [0, 0], sizes = [7, 32], strides = [1, 1]} : vector<8x32xf32> to vector<7x32xf32>
    %36 = tpu.concatenate %34, %35 in 0 : vector<1x32xf32>, vector<7x32xf32> -> vector<8x32xf32>
    %37 = arith.truncf %33 : vector<8x32xf32> to vector<8x32xbf16>
    %c0_17 = arith.constant 0 : index
    %c0_18 = arith.constant 0 : index
    %38 = vector.load %arg4[%c0_17, %c0_18] : memref<32x96xbf16, #tpu.memory_space<vmem>>, vector<32x96xbf16>
    %cst_19 = arith.constant dense<0.000000e+00> : vector<8x96xf32>
    %39 = tpu.matmul %37, %38, %cst_19 {dimension_numbers = #tpu.dot_dimension_numbers<[1], [0], [0], [1], [0, 0, 1, 1], [], []>} : vector<8x32xbf16>, vector<32x96xbf16>, vector<8x96xf32> -> vector<8x96xf32>
    %40 = arith.truncf %36 : vector<8x32xf32> to vector<8x32xbf16>
    %c0_20 = arith.constant 0 : index
    %c0_21 = arith.constant 0 : index
    %41 = vector.load %arg5[%c0_20, %c0_21] : memref<32x96xbf16, #tpu.memory_space<vmem>>, vector<32x96xbf16>
    %cst_22 = arith.constant dense<0.000000e+00> : vector<8x96xf32>
    %42 = tpu.matmul %40, %41, %cst_22 {dimension_numbers = #tpu.dot_dimension_numbers<[1], [0], [0], [1], [0, 0, 1, 1], [], []>} : vector<8x32xbf16>, vector<32x96xbf16>, vector<8x96xf32> -> vector<8x96xf32>
    %43 = arith.addf %39, %42 : vector<8x96xf32>
    %44 = vector.extract_strided_slice %43 {offsets = [0, 0], sizes = [8, 32], strides = [1, 1]} : vector<8x96xf32> to vector<8x32xf32>
    %c0_23 = arith.constant 0 : index
    %c0_24 = arith.constant 0 : index
    %c0_25 = arith.constant 0 : index
    %45 = vector.load %arg7[%c0_23, %c0_24, %c0_25] : memref<1x8x32xf32, #tpu.memory_space<vmem>>, vector<1x8x32xf32>
    %46 = vector.shape_cast %45 : vector<1x8x32xf32> to vector<8x32xf32>
    %47 = vector.shape_cast %44 : vector<8x32xf32> to vector<1x8x32xf32>
    tpu.vector_store %arg7[%c0_23, %c0_24, %c0_25], %47 {strides = array<i32>} : memref<1x8x32xf32, #tpu.memory_space<vmem>>, vector<1x8x32xf32>,
    %48 = vector.extract_strided_slice %43 {offsets = [0, 32], sizes = [8, 32], strides = [1, 1]} : vector<8x96xf32> to vector<8x32xf32>
    %c0_26 = arith.constant 0 : index
    %c0_27 = arith.constant 0 : index
    %c0_28 = arith.constant 0 : index
    %49 = vector.load %arg8[%c0_26, %c0_27, %c0_28] : memref<1x8x32xf32, #tpu.memory_space<vmem>>, vector<1x8x32xf32>
    %50 = vector.shape_cast %49 : vector<1x8x32xf32> to vector<8x32xf32>
    %51 = vector.shape_cast %48 : vector<8x32xf32> to vector<1x8x32xf32>
    tpu.vector_store %arg8[%c0_26, %c0_27, %c0_28], %51 {strides = array<i32>} : memref<1x8x32xf32, #tpu.memory_space<vmem>>, vector<1x8x32xf32>,
    %52 = vector.extract_strided_slice %43 {offsets = [0, 64], sizes = [8, 32], strides = [1, 1]} : vector<8x96xf32> to vector<8x32xf32>
    %53 = arith.negf %52 : vector<8x32xf32>
    %54 = math.exp %53 : vector<8x32xf32>
    %cst_29 = arith.constant 1.000000e+00 : f32
    %55 = vector.broadcast %cst_29 : f32 to vector<8x32xf32>
    %56 = arith.addf %55, %54 : vector<8x32xf32>
    %57 = arith.divf %55, %56 : vector<8x32xf32>
    %c0_30 = arith.constant 0 : index
    %c0_31 = arith.constant 0 : index
    %c0_32 = arith.constant 0 : index
    %58 = vector.load %arg9[%c0_30, %c0_31, %c0_32] : memref<1x8x32xf32, #tpu.memory_space<vmem>>, vector<1x8x32xf32>
    %59 = vector.shape_cast %58 : vector<1x8x32xf32> to vector<8x32xf32>
    %60 = vector.shape_cast %57 : vector<8x32xf32> to vector<1x8x32xf32>
    tpu.vector_store %arg9[%c0_30, %c0_31, %c0_32], %60 {strides = array<i32>} : memref<1x8x32xf32, #tpu.memory_space<vmem>>, vector<1x8x32xf32>,
    return
  }
  func.func @transform_0(%arg0: i32) -> (i32, i32, i32) {
    %c0_i32 = arith.constant 0 : i32
    %c0_i32_0 = arith.constant 0 : i32
    %c0_i32_1 = arith.constant 0 : i32
    return %arg0, %c0_i32, %c0_i32_0 : i32, i32, i32
  }
  func.func @transform_1(%arg0: i32) -> (i32, i32) {
    %c0_i32 = arith.constant 0 : i32
    %c0_i32_0 = arith.constant 0 : i32
    %c0_i32_1 = arith.constant 0 : i32
    return %c0_i32, %c0_i32_0 : i32, i32
  }
  func.func @transform_2(%arg0: i32) -> (i32, i32) {
    %c0_i32 = arith.constant 0 : i32
    %c0_i32_0 = arith.constant 0 : i32
    %c0_i32_1 = arith.constant 0 : i32
    return %c0_i32, %c0_i32_0 : i32, i32
  }
  func.func @transform_3(%arg0: i32) -> (i32, i32) {
    %c0_i32 = arith.constant 0 : i32
    %c0_i32_0 = arith.constant 0 : i32
    %c0_i32_1 = arith.constant 0 : i32
    return %c0_i32, %c0_i32_0 : i32, i32
  }
  func.func @transform_4(%arg0: i32) -> (i32, i32) {
    %c0_i32 = arith.constant 0 : i32
    %c0_i32_0 = arith.constant 0 : i32
    %c0_i32_1 = arith.constant 0 : i32
    return %c0_i32, %c0_i32_0 : i32, i32
  }
  func.func @transform_5(%arg0: i32) -> (i32, i32, i32) {
    %c0_i32 = arith.constant 0 : i32
    %c0_i32_0 = arith.constant 0 : i32
    %c0_i32_1 = arith.constant 0 : i32
    return %arg0, %c0_i32, %c0_i32_0 : i32, i32, i32
  }
  func.func @transform_6(%arg0: i32) -> (i32, i32, i32) {
    %c0_i32 = arith.constant 0 : i32
    %c0_i32_0 = arith.constant 0 : i32
    %c0_i32_1 = arith.constant 0 : i32
    return %arg0, %c0_i32, %c0_i32_0 : i32, i32, i32
  }
  func.func @transform_7(%arg0: i32) -> (i32, i32, i32) {
    %c0_i32 = arith.constant 0 : i32
    %c0_i32_0 = arith.constant 0 : i32
    %c0_i32_1 = arith.constant 0 : i32
    return %arg0, %c0_i32, %c0_i32_0 : i32, i32, i32
  }
  func.func @transform_8(%arg0: i32) -> (i32, i32, i32) {
    %c0_i32 = arith.constant 0 : i32
    %c0_i32_0 = arith.constant 0 : i32
    %c0_i32_1 = arith.constant 0 : i32
    return %arg0, %c0_i32, %c0_i32_0 : i32, i32, i32
  }
}

module attributes {stable_mosaic.version = 11 : i64} {
  func.func @_head_kernel(%arg0: i32, %arg1: i32, %arg2: memref<16x32xf32, #tpu.memory_space<vmem>>, %arg3: memref<2x32xf32, #tpu.memory_space<vmem>>, %arg4: memref<32x64xbf16, #tpu.memory_space<vmem>>, %arg5: memref<16x64xf32, #tpu.memory_space<vmem>>) attributes {dimension_semantics = [#tpu.dimension_semantics<parallel>, #tpu.dimension_semantics<parallel>], iteration_bounds = array<i64: 1, 1>, scalar_prefetch = 0 : i64, scratch_operands = 0 : i64, tpu.core_type = #tpu.core_type<tc>, window_params = [{transform_indices = @transform_0, window_bounds = array<i64: 16, 32>}, {pipeline_mode = #tpu.pipeline_mode<synchronous>, transform_indices = @transform_1, window_bounds = array<i64: 2, 32>}, {transform_indices = @transform_2, window_bounds = array<i64: 32, 64>}, {transform_indices = @transform_3, window_bounds = array<i64: 16, 64>}]} {
    %c0 = arith.constant 0 : index
    %c0_0 = arith.constant 0 : index
    %0 = vector.load %arg2[%c0, %c0_0] : memref<16x32xf32, #tpu.memory_space<vmem>>, vector<16x32xf32>
    %c0_1 = arith.constant 0 : index
    %c0_2 = arith.constant 0 : index
    %1 = vector.load %arg3[%c0_1, %c0_2] : memref<2x32xf32, #tpu.memory_space<vmem>>, vector<1x32xf32>
    %c1 = arith.constant 1 : index
    %c0_3 = arith.constant 0 : index
    %2 = vector.load %arg3[%c1, %c0_3] : memref<2x32xf32, #tpu.memory_space<vmem>>, vector<1x32xf32>
    %cst = arith.constant dense<0.000000e+00> : vector<16xf32>
    %3 = vector.multi_reduction <add>, %0, %cst [1] : vector<16x32xf32> to vector<16xf32>
    %4 = vector.shape_cast %3 : vector<16xf32> to vector<16x1xf32>
    %cst_4 = arith.constant 3.200000e+01 : f32
    %5 = vector.broadcast %cst_4 : f32 to vector<16x1xf32>
    %6 = arith.divf %4, %5 : vector<16x1xf32>
    %7 = vector.broadcast %6 : vector<16x1xf32> to vector<16x32xf32>
    %8 = arith.subf %0, %7 : vector<16x32xf32>
    %9 = arith.mulf %8, %8 : vector<16x32xf32>
    %cst_5 = arith.constant dense<0.000000e+00> : vector<16xf32>
    %10 = vector.multi_reduction <add>, %9, %cst_5 [1] : vector<16x32xf32> to vector<16xf32>
    %11 = vector.shape_cast %10 : vector<16xf32> to vector<16x1xf32>
    %cst_6 = arith.constant 3.200000e+01 : f32
    %12 = vector.broadcast %cst_6 : f32 to vector<16x1xf32>
    %13 = arith.divf %11, %12 : vector<16x1xf32>
    %14 = vector.broadcast %6 : vector<16x1xf32> to vector<16x32xf32>
    %15 = arith.subf %0, %14 : vector<16x32xf32>
    %cst_7 = arith.constant 9.99999974E-6 : f32
    %16 = vector.broadcast %cst_7 : f32 to vector<16x1xf32>
    %17 = arith.addf %13, %16 : vector<16x1xf32>
    %18 = math.rsqrt %17 : vector<16x1xf32>
    %19 = vector.broadcast %18 : vector<16x1xf32> to vector<16x32xf32>
    %20 = arith.mulf %15, %19 : vector<16x32xf32>
    %21 = vector.broadcast %1 : vector<1x32xf32> to vector<16x32xf32>
    %22 = arith.mulf %20, %21 : vector<16x32xf32>
    %23 = vector.broadcast %2 : vector<1x32xf32> to vector<16x32xf32>
    %24 = arith.addf %22, %23 : vector<16x32xf32>
    %25 = arith.truncf %24 : vector<16x32xf32> to vector<16x32xbf16>
    %c0_8 = arith.constant 0 : index
    %c0_9 = arith.constant 0 : index
    %26 = vector.load %arg4[%c0_8, %c0_9] : memref<32x64xbf16, #tpu.memory_space<vmem>>, vector<32x64xbf16>
    %cst_10 = arith.constant dense<0.000000e+00> : vector<16x64xf32>
    %27 = tpu.matmul %25, %26, %cst_10 {dimension_numbers = #tpu.dot_dimension_numbers<[1], [0], [0], [1], [0, 0, 1, 1], [], []>} : vector<16x32xbf16>, vector<32x64xbf16>, vector<16x64xf32> -> vector<16x64xf32>
    %c0_11 = arith.constant 0 : index
    %c0_12 = arith.constant 0 : index
    %28 = vector.load %arg5[%c0_11, %c0_12] : memref<16x64xf32, #tpu.memory_space<vmem>>, vector<16x64xf32>
    tpu.vector_store %arg5[%c0_11, %c0_12], %27 {strides = array<i32>} : memref<16x64xf32, #tpu.memory_space<vmem>>, vector<16x64xf32>,
    return
  }
  func.func @transform_0(%arg0: i32, %arg1: i32) -> (i32, i32) {
    %c0_i32 = arith.constant 0 : i32
    %c0_i32_0 = arith.constant 0 : i32
    return %arg0, %c0_i32 : i32, i32
  }
  func.func @transform_1(%arg0: i32, %arg1: i32) -> (i32, i32) {
    %c0_i32 = arith.constant 0 : i32
    %c0_i32_0 = arith.constant 0 : i32
    %c0_i32_1 = arith.constant 0 : i32
    return %c0_i32, %c0_i32_0 : i32, i32
  }
  func.func @transform_2(%arg0: i32, %arg1: i32) -> (i32, i32) {
    %c0_i32 = arith.constant 0 : i32
    %c0_i32_0 = arith.constant 0 : i32
    return %c0_i32, %arg1 : i32, i32
  }
  func.func @transform_3(%arg0: i32, %arg1: i32) -> (i32, i32) {
    %c0_i32 = arith.constant 0 : i32
    return %arg0, %arg1 : i32, i32
  }
}

</mosaic_0001>

<bundles_post_ra>
// kernel: point_rwkv_forward.8
= control target key start
LH: loop header
LB: loop body
LE: loop exit
PB: predicated region body
PF: predicated region fallthrough
CT: control target
= control target key end

     0   :  { %s265_s9 = smov 0   ;;  %s291_s0 = inlined_call_operand.vmem [shape: f32[2,8,32], index: 0, kind: input, shape index: {}]   ;;  %s292_s1 = inlined_call_operand.vmem [shape: f32[2,32], index: 1, kind: input, shape index: {}]   ;;  %s293_s2 = inlined_call_operand.vmem [shape: f32[2,8,32], index: 2, kind: output, shape index: {}]  }
   0x1 LB: > { %s221_s10 = sadd.s32 4294967295, %s248_s9   ;;  %p225_p0 = scmp.ge.s32.totalorder %s248_s9, 1  ;;  %s248_s9 = sphi %s265_s9, %s12_s9  }
   0x2   : > { %p111_p1 = scmp.lt.s32.totalorder %s248_s9, 3 }
   0x4   : > { %p112_p2 = pnand %p225_p0, %p111_p1 }
   0x5   : > { %p131_p3 = scmp.lt.s32.totalorder (!%p112_p2), %s221_s10, 1  ;;  %vm142_vm0 = vcmask (!%p112_p2), 261120   ;;  %v228_v11 = vld [vmem:[%s292_s1] ss:$0 sm:$0xff] (!%p112_p2)  ;;  %v229_v13 = vld [vmem:[%s292_s1 + $0x1] ss:$0 sm:$0xff] (!%p112_p2) }
   0x6   : > { %115 = sbr.rel (%p112_p2) target bundleno = 331 (0x14b), region = 28 }
   0xd   : > { %s295_s10 = smov (!%p131_p3, %s221_s10), 1 }
   0xe   : > { %s226_s11 = sshll.u32 %s295_s10, 3 }
   0xf   : > { %s134_s14 = scalar_lea.vmem %s291_s0, %s226_s11  ;;  %s138_s21 = scalar_lea.vmem %s293_s2, %s226_s11 }
  0x10   : > { %v139_v0 = vld [vmem:[%s134_s14] sm:$0xff] }
  0x11   : > { %v143_v1 = vsel %vm142_vm0, %v139_v0, 0.0 }
  0x12   : > { %144 = vadd.xlane.f32.xlu0 %v143_v1 }
  0x9f   : > { %v145_v2 = vpop.xlane.xlu0 %144 }
  0xa0   : > { %v147_v3 = vmul.f32 0.03125, %v145_v2 }
  0xa2   : > { %v148_v4 = vsub.f32 %v139_v0, %v147_v3 }
  0xa4   : > { %v149_v5 = vmul.f32 %v148_v4, %v148_v4 }
  0xa6   : > { %v150_v6 = vsel %vm142_vm0, %v149_v5, 0.0 }
  0xa7   : > { %151 = vadd.xlane.f32.xlu0 %v150_v6 }
 0x134   : > { %v152_v7 = vpop.xlane.xlu0 %151 }
 0x135   : > { %v153_v8 = vmul.f32 0.03125, %v152_v7 }
 0x137   : > { %v154_v9 = vadd.f32 1e-05, %v153_v8 }
 0x139   : > { %240 = vrsqrt.f32 %v154_v9 }
 0x143   : > { %v241_v10 = vpop.eup %240 }
 0x144   : > { %v156_v12 = vmul.f32 %v241_v10, %v148_v4 }
 0x146   : > { %v161_v14 = vmul.f32 %v228_v11, %v156_v12 }
 0x148   : > { %v166_v15 = vadd.f32 %v229_v13, %v161_v14 }
 0x14a   : > { %167 = vst.msk [vmem:[%s138_s21] sm:$0xff] %vm142_vm0, %v166_v15 }
 0x14b PF: > { %s12_s9 = sadd.s32 1, %s248_s9  }
 0x14c   : > { %p9_p4 = scmp.ge.s32.totalorder %s12_s9, 4  }
 0x14e   :  { %11 = sbr.rel (!%p9_p4) target bundleno = 1 (0x1), region = 58 }

// kernel: point_rwkv_forward.10
= control target key start
LH: loop header
LB: loop body
LE: loop exit
PB: predicated region body
PF: predicated region fallthrough
CT: control target
= control target key end

     0   :  { %s621_s15 = smov 0   ;;  %s623_s16 = smov 0   ;;  %s697_s0 = inlined_call_operand.vmem [shape: f32[1,32], index: 0, kind: input, shape index: {}]   ;;  %s698_s1 = inlined_call_operand.vmem [shape: f32[1,32], index: 1, kind: input, shape index: {}]   ;;  %s699_s2 = inlined_call_operand.vmem [shape: f32[2,8,32], index: 2, kind: input, shape index: {}]   ;;  %s700_s3 = inlined_call_operand.vmem [shape: f32[2,8,32], index: 3, kind: input, shape index: {}]   ;;  %s701_s4 = inlined_call_operand.vmem [shape: f32[2,8,32], index: 4, kind: output, shape index: {}]  }
   0x1   :  { %s625_s17 = smov 0  }
   0x2 LB: > { %s26_s18 = sadd.s32 1, %s574_s16  ;;  %p466_p0 = scmp.ge.s32.totalorder %s578_s17, 1  ;;  %s578_s17 = sphi %s625_s17, %s14_s17   ;;  %s574_s16 = sphi %s623_s16, %s703_s16   ;;  %s570_s15 = sphi %s621_s15, %s702_s15  }
   0x3   : > { %p28_p1 = scmp.ge.s32.totalorder %s26_s18, 2  ;;  %p210_p2 = scmp.lt.s32.totalorder %s578_s17, 3 }
   0x5   : > { %s705_s18 = smov (%p28_p1, %s26_s18), 0  ;;  %p211_p3 = pnand %p466_p0, %p210_p2 }
   0x6   : > { %p259_p4 = scmp.lt.s32.totalorder (!%p211_p3), %s570_s15, 1  ;;  %v280_v0 = vld [vmem:[%s697_s0] sm:$0x1] (!%p211_p3)  ;;  %v580_v5 = vmov (!%p211_p3), -1e+38   ;;  %v584_v6 = vmov (!%p211_p3), 0.0  }
   0x7   : > { %214 = sbr.rel (%p211_p3) target bundleno = 61 (0x3d), region = 36  ;;  %v645_v1 = vld [vmem:[%s698_s1] sm:$0x1] (!%p211_p3)  ;;  %v281_v2 = vmul.f32 (!%p211_p3), 1.442695, %v280_v0  ;;  %v588_v7 = vmov (!%p211_p3), 0.0  }
   0x8   : > { %s661_s7 = smov (!%p211_p3), 0  }
   0x9   : > { %528 = vpow2.f32 (!%p211_p3), %v281_v2 }
   0xe   : > { %s707_s15 = smov (!%p259_p4, %s570_s15), 1 }
   0xf   : > { %s647_s23 = sshll.u32 %s707_s15, 3 }
  0x10   : > { %s265_s26 = scalar_lea.vmem %s699_s2, %s647_s23  ;;  %s272_s29 = scalar_lea.vmem %s700_s3, %s647_s23 }
  0x11   : > { %s279_s6 = scalar_lea.vmem %s701_s4, %s647_s23 }
  0x13   : > { %v529_v3 = vpop.eup %528 }
  0x14   : > { %v283_v4 = vsub.f32 0.0, %v529_v3 }
  0x15 LB: >> { %s294_s10 = scalar_lea.vmem %s265_s26, %s594_s7  ;;  %s296_s13 = scalar_lea.vmem %s272_s29, %s594_s7  ;;  %vm314_vm0 = vcmask 253952   ;;  %s594_s7 = sphi %s661_s7, %s290_s7   ;;  %v590_v7 = vphi %v588_v7, %v589_v7   ;;  %v586_v6 = vphi %v584_v6, %v328_v6   ;;  %v582_v5 = vphi %v580_v5, %v581_v5  }
  0x16   : >> { %v316_v8 = vadd.f32 %v582_v5, %v283_v4  ;;  %v295_v9 = vld [vmem:[%s294_s10] sm:$0x1]  ;;  %s313_s19 = scalar_lea.vmem %s279_s6, %s594_s7  ;;  %s290_s7 = sadd.s32 1, %s594_s7  }
  0x17   : >> { %v298_v10 = vadd.f32 %v295_v9, %v645_v1  ;;  %v297_v23 = vld [vmem:[%s296_s13] sm:$0x1]  ;;  %p287_p5 = scmp.ge.s32.totalorder %s290_s7, 8  }
  0x18   : >> { %v317_v11 = vmax.f32 %v316_v8, %v295_v9  }
  0x19   : >> { %v299_v12 = vmax.f32 %v582_v5, %v298_v10 }
  0x1a   : >> { %v318_v13 = vsub.f32 %v316_v8, %v317_v11  ;;  %v321_v14 = vsub.f32 %v295_v9, %v317_v11 }
  0x1b   : >> { %v300_v15 = vsub.f32 %v582_v5, %v299_v12  ;;  %v303_v16 = vsub.f32 %v298_v10, %v299_v12  ;;  %v581_v5 = vmov %v317_v11  }
  0x1c   : >> { %v319_v17 = vmul.f32 1.442695, %v318_v13  ;;  %v322_v18 = vmul.f32 1.442695, %v321_v14 }
  0x1d   : >> { %v301_v19 = vmul.f32 1.442695, %v300_v15  ;;  %v304_v20 = vmul.f32 1.442695, %v303_v16 }
  0x1e   : >> { %530 = vpow2.f32 %v319_v17 }
  0x1f   : >> { %532 = vpow2.f32 %v322_v18 }
  0x20   : >> { %534 = vpow2.f32 %v301_v19 }
  0x21   : >> { %536 = vpow2.f32 %v304_v20 }
  0x28   : >> { %v531_v21 = vpop.eup %530 }
  0x29   : >> { %v533_v22 = vpop.eup %532  ;;  %v324_v24 = vmul.f32 %v590_v7, %v531_v21  ;;  %v327_v25 = vmul.f32 %v586_v6, %v531_v21 }
  0x2a   : >> { %v535_v26 = vpop.eup %534  ;;  %v325_v27 = vmul.f32 %v533_v22, %v297_v23 }
  0x2b   : >> { %v537_v28 = vpop.eup %536  ;;  %v309_v29 = vmul.f32 %v586_v6, %v535_v26  ;;  %v328_v6 = vadd.f32 %v533_v22, %v327_v25   ;;  %v306_v32 = vmul.f32 %v590_v7, %v535_v26 }
  0x2c   : >> { %v326_v30 = vadd.f32 %v325_v27, %v324_v24   ;;  %v307_v33 = vmul.f32 %v537_v28, %v297_v23 }
  0x2d   : >> { %v310_v31 = vadd.f32 %v537_v28, %v309_v29 }
  0x2e   : >> { %v308_v34 = vadd.f32 %v307_v33, %v306_v32  ;;  %v589_v7 = vmov %v326_v30  }
  0x2f   : >> { %538 = vrcp.f32 %v310_v31 }
  0x36   : > { %289 = sbr.rel (!%p287_p5) target bundleno = 21 (0x15), region = 85 }
  0x39   : >> { %v539_v35 = vpop.eup %538 }
  0x3a   : >> { %v312_v36 = vmul.f32 %v539_v35, %v308_v34 }
  0x3c   : >> { %315 = vst.msk [vmem:[%s313_s19] sm:$0x1] %vm314_vm0, %v312_v36 }
  0x3d PF: > { %s14_s17 = sadd.s32 1, %s578_s17   ;;  %s702_s15 = smov %s574_s16 }
  0x3e   : > { %p11_p6 = scmp.ge.s32.totalorder %s14_s17, 4   ;;  %s703_s16 = smov %s705_s18 }
  0x40   :  { %13 = sbr.rel (!%p11_p6) target bundleno = 2 (0x2), region = 96 }

// kernel: point_rwkv_forward.9
= control target key start
LH: loop header
LB: loop body
LE: loop exit
PB: predicated region body
PF: predicated region fallthrough
CT: control target
= control target key end

     0   :  { %s853_s27 = smov 0   ;;  %s922_s0 = inlined_call_operand.vmem [shape: f32[2,8,32], index: 0, kind: input, shape index: {}]   ;;  %s923_s1 = inlined_call_operand.vmem [shape: f32[2,32], index: 1, kind: input, shape index: {}]   ;;  %s924_s2 = inlined_call_operand.vmem [shape: bf16[32,32], index: 2, kind: input, shape index: {}]   ;;  %s925_s3 = inlined_call_operand.vmem [shape: bf16[32,96], index: 3, kind: input, shape index: {}]   ;;  %s926_s4 = inlined_call_operand.vmem [shape: bf16[32,96], index: 4, kind: input, shape index: {}]   ;;  %s927_s5 = inlined_call_operand.vmem [shape: f32[2,8,32], index: 5, kind: output, shape index: {0}]   ;;  %s928_s6 = inlined_call_operand.vmem [shape: f32[2,8,32], index: 6, kind: output, shape index: {1}]   ;;  %s929_s7 = inlined_call_operand.vmem [shape: f32[2,8,32], index: 7, kind: output, shape index: {2}]   ;;  %s930_s8 = inlined_call_operand.vmem [shape: f32[2,8,32], index: 8, kind: output, shape index: {3}]  }
   0x1 LB: > { %s711_s28 = sadd.s32 4294967295, %s802_s27   ;;  %p715_p0 = scmp.ge.s32.totalorder %s802_s27, 1  ;;  %s802_s27 = sphi %s853_s27, %s19_s27  }
   0x2   : > { %p268_p1 = scmp.lt.s32.totalorder %s802_s27, 3 }
   0x4   : > { %p269_p2 = pnand %p715_p0, %p268_p1 }
   0x5   : > { %p312_p3 = scmp.lt.s32.totalorder (!%p269_p2), %s711_s28, 1  ;;  %vm351_vm0 = vcmask (!%p269_p2), 261120   ;;  %v784_v7 = vld [vmem:[%s926_s4] sm:$0xff] (!%p269_p2)   ;;  %v804_v8 = vmov (!%p269_p2), 0.0   ;;  %vm805_vm1 = vmmov (!%p269_p2), 0   ;;  %v785_v9 = vld [vmem:[%s926_s4 + $0x8] sm:$0xff] (!%p269_p2)  }
   0x6   : > { %272 = sbr.rel (%p269_p2) target bundleno = 701 (0x2bd), region = 40  ;;  %752 = vmatprep.subr.bf16.mxu1 (!%p269_p2), %v804_v8  ;;  %756 = vmatprep.mubr.msk.bf16.mxu1 (!%p269_p2), %vm805_vm1, %v804_v8  ;;  %v788_v10 = vld [vmem:[%s924_s2] sm:$0xff] (!%p269_p2)   ;;  %v789_v11 = vld [vmem:[%s924_s2 + $0x8] sm:$0xff] (!%p269_p2)   ;;  %vm426_vm2 = vcmask (!%p269_p2), 1040384   ;;  %s806_s13 = smov (!%p269_p2), 96  }
   0x7   : > { %753 = vmatpush3.bf16.msra.mxu1 (!%p269_p2), %v784_v7  ;;  %744 = vmatprep.subr.bf16.mxu0 (!%p269_p2), %v804_v8  ;;  %v724_v17 = vld [vmem:[%s923_s1] ss:$0 sm:$0xff] (!%p269_p2)  ;;  %v725_v19 = vld [vmem:[%s923_s1 + $0x1] ss:$0 sm:$0xff] (!%p269_p2)  ;;  %v787_v26 = vld [vmem:[%s925_s3 + $0x8] sm:$0xff] (!%p269_p2)   ;;  %s807_s14 = smov (!%p269_p2), 64  }
   0x8   : > { %754 = vmatprep.subr.bf16.mxu1 (!%p269_p2), %v804_v8  ;;  %748 = vmatprep.mubr.msk.bf16.mxu0 (!%p269_p2), %vm805_vm1, %v804_v8  ;;  %v786_v24 = vld [vmem:[%s925_s3] sm:$0xff] (!%p269_p2)  }
   0x9   : > { %745 = vmatpush3.bf16.msra.mxu0 (!%p269_p2), %v788_v10 }
   0xa   : > { %746 = vmatprep.subr.bf16.mxu0 (!%p269_p2), %v804_v8 }
   0xb   : > { %755 = vmatpush3.bf16.msra.mxu1 (!%p269_p2), %v785_v9 }
   0xc   : > { %760 = vmatprep.subr.bf16.mxu1 (!%p269_p2), %v804_v8 }
   0xd   : > { %s932_s28 = smov (!%p312_p3, %s711_s28), 1  ;;  %747 = vmatpush3.bf16.msra.mxu0 %v789_v11 }
   0xe   : > { %s861_s29 = sshll.u32 %s932_s28, 3 }
   0xf   : > { %s315_s10 = scalar_lea.vmem %s922_s0, %s861_s29  ;;  %s319_s9 = scalar_lea.vmem %s927_s5, %s861_s29 }
  0x10   : > { %v333_v0 = vld [vmem:[%s315_s10] sm:$0xff]  ;;  %s323_s12 = scalar_lea.vmem %s928_s6, %s861_s29  ;;  %s327_s17 = scalar_lea.vmem %s929_s7, %s861_s29 }
  0x11   : > { %v399_v1 = vsel %vm351_vm0, %v333_v0, 0.0  ;;  %v334_v12 = vpack.c.bf16 %v333_v0, %v333_v0  ;;  %s331_s20 = scalar_lea.vmem %s930_s8, %s861_s29 }
  0x12   : > { %400 = vadd.xlane.f32.xlu0 %v399_v1 }
  0x13   : > { %749 = vmatmul.mubr.msk.bf16.vlgmr.msra.gmra.mrb[0].mxu0 %vm351_vm0, %v334_v12 }
  0x9f   : > { %v401_v2 = vpop.xlane.xlu0 %400 }
  0xa0   : > { %v403_v3 = vmul.f32 0.03125, %v401_v2 }
  0xa2   : > { %v404_v4 = vsub.f32 %v333_v0, %v403_v3 }
  0xa4   : > { %v405_v5 = vmul.f32 %v404_v4, %v404_v4 }
  0xa6   : > { %v406_v6 = vsel %vm351_vm0, %v405_v5, 0.0 }
  0xa7   : > { %407 = vadd.xlane.f32.xlu0 %v406_v6 }
  0xe6   : > { %v389_v28 = vpop.f32.mrb[0].mxu0 }
  0xe7   : > { %v395_v29 = vmax.f32 %v389_v28, 0.0  ;;  %v750_v30 = vpop.f32.mrb[1].mxu0 }
  0xe8   : > { %v392_v31 = vpop.f32.mrb[2].mxu0 }
  0xe9   : > { %396 = vst.msk [vmem:[%s319_s9] sm:$0xff] %vm351_vm0, %v395_v29  ;;  %v751_v32 = vpop.f32.mrb[3].mxu0 }
 0x134   : > { %v408_v13 = vpop.xlane.xlu0 %407 }
 0x135   : > { %v409_v14 = vmul.f32 0.03125, %v408_v13 }
 0x137   : > { %v410_v15 = vadd.f32 1e-05, %v409_v14 }
 0x139   : > { %790 = vrsqrt.f32 %v410_v15 }
 0x143   : > { %v791_v16 = vpop.eup %790 }
 0x144   : > { %v412_v18 = vmul.f32 %v791_v16, %v404_v4 }
 0x146   : > { %v417_v20 = vmul.f32 %v724_v17, %v412_v18 }
 0x148   : > { %v422_v21 = vadd.f32 %v725_v19, %v417_v20 }
 0x14a   : > { %v424_v22 = vrot.slane %v422_v21, 7  ;;  %v428_v27 = vpack.c.bf16 %v422_v21, %v422_v21 }
 0x14c   : > { %v427_v23 = vsel %vm426_vm2, 0.0, %v424_v22 }
 0x14d   : > { %v433_v25 = vpack.c.bf16 %v427_v23, %v427_v23 }
 0x14f   : > { %757 = vmatmul.mubr.msk.bf16.vlgmr.msra.gmra.mrb[0].mxu1 %vm351_vm0, %v433_v25 }
 0x150   : > { %761 = vmatpush3.bf16.msra.mxu1 %v786_v24  ;;  %764 = vmatprep.mubr.msk.bf16.mxu1 %vm805_vm1, %v804_v8 }
 0x151   : > { %762 = vmatprep.subr.bf16.mxu1 %v804_v8 }
 0x154   : > { %763 = vmatpush3.bf16.msra.mxu1 %v787_v26 }
 0x15b   : > { %765 = vmatmul.mubr.msk.bf16.vlgmr.msra.gmra.mrb[0].mxu1 %vm351_vm0, %v428_v27 }
 0x22e   : > { %v542_v33 = vpop.f32.mrb[0].mxu1 }
 0x22f   : > { %548 = vst.msk [vmem:[%s323_s12] sm:$0xff] %vm351_vm0, %v542_v33  ;;  %v732_v34 = vmul.f32 -1.442695, %v542_v33  ;;  %550 = vrot.lane.b32.xlu1 %v542_v33, %s806_s13  ;;  %v766_v35 = vpop.f32.mrb[1].mxu1 }
 0x230   : > { %v545_v36 = vpop.f32.mrb[2].mxu1 }
 0x231   : > { %792 = vpow2.f32 %v732_v34  ;;  %v767_v37 = vpop.f32.mrb[3].mxu1 }
 0x23b   : > { %v793_v38 = vpop.eup %792 }
 0x23c   : > { %v557_v39 = vadd.f32 1.0, %v793_v38 }
 0x23e   : > { %794 = vrcp.f32 %v557_v39 }
 0x248   : > { %v795_v40 = vpop.eup %794 }
 0x249   : > { %561 = vrot.lane.b32.xlu1 %v795_v40, %s807_s14 }
 0x2a1   : > { %v551_v41 = vpop.permute.xlu1 %550 }
 0x2a2   : > { %553 = vst.msk [vmem:[%s327_s17] sm:$0xff] %vm351_vm0, %v551_v41 }
 0x2bb   : > { %v562_v42 = vpop.permute.xlu1 %561 }
 0x2bc   : > { %564 = vst.msk [vmem:[%s331_s20] sm:$0xff] %vm351_vm0, %v562_v42 }
 0x2bd PF: > { %s19_s27 = sadd.s32 1, %s802_s27  }
 0x2be   : > { %p16_p4 = scmp.ge.s32.totalorder %s19_s27, 4  }
 0x2c0   :  { %18 = sbr.rel (!%p16_p4) target bundleno = 1 (0x1), region = 106 }

// kernel: point_rwkv_forward.11
= control target key start
LH: loop header
LB: loop body
LE: loop exit
PB: predicated region body
PF: predicated region fallthrough
CT: control target
= control target key end

     0   :  { %s955_s30 = smov 0   ;;  %s1053_s0 = inlined_call_operand.vmem [shape: f32[2,8,32], index: 0, kind: input, shape index: {}]   ;;  %s1054_s1 = inlined_call_operand.vmem [shape: f32[2,8,32], index: 1, kind: input, shape index: {}]   ;;  %s1055_s2 = inlined_call_operand.vmem [shape: f32[2,8,32], index: 2, kind: input, shape index: {}]   ;;  %s1056_s3 = inlined_call_operand.vmem [shape: f32[2,8,32], index: 3, kind: input, shape index: {}]   ;;  %s1057_s4 = inlined_call_operand.vmem [shape: f32[2,32], index: 4, kind: input, shape index: {}]   ;;  %s1058_s5 = inlined_call_operand.vmem [shape: bf16[32,32], index: 5, kind: input, shape index: {}]   ;;  %s1059_s6 = inlined_call_operand.vmem [shape: bf16[32,96], index: 6, kind: input, shape index: {}]   ;;  %s1060_s7 = inlined_call_operand.vmem [shape: bf16[32,96], index: 7, kind: input, shape index: {}]   ;;  %s1061_s8 = inlined_call_operand.vmem [shape: bf16[64,32], index: 8, kind: input, shape index: {}]   ;;  %s1062_s9 = inlined_call_operand.vmem [shape: f32[2,8,32], index: 9, kind: output, shape index: {}]  }
   0x1 LB: > { %s784_s10 = sadd.s32 4294967295, %s900_s30   ;;  %p788_p0 = scmp.ge.s32.totalorder %s900_s30, 1  ;;  %s900_s30 = sphi %s955_s30, %s19_s30  }
   0x2   : > { %p313_p1 = scmp.lt.s32.totalorder %s900_s30, 3 }
   0x4   : > { %p314_p2 = pnand %p788_p0, %p313_p1 }
   0x5   : > { %v878_v0 = vld [vmem:[%s1058_s5] sm:$0xff] (!%p314_p2)   ;;  %v902_v1 = vmov (!%p314_p2), 0.0   ;;  %v879_v2 = vld [vmem:[%s1058_s5 + $0x8] sm:$0xff] (!%p314_p2)   ;;  %vm903_vm0 = vmmov (!%p314_p2), 0   ;;  %p359_p3 = scmp.lt.s32.totalorder (!%p314_p2), %s784_s10, 1  ;;  %vm400_vm1 = vcmask (!%p314_p2), 261120  }
   0x6   : > { %317 = sbr.rel (%p314_p2) target bundleno = 1233 (0x4d1), region = 56  ;;  %827 = vmatprep.subr.bf16.mxu0 (!%p314_p2), %v902_v1  ;;  %835 = vmatprep.subr.bf16.mxu1 (!%p314_p2), %v902_v1  ;;  %v880_v19 = vld [vmem:[%s1060_s7] sm:$0xff] (!%p314_p2)   ;;  %v881_v20 = vld [vmem:[%s1060_s7 + $0x8] sm:$0xff] (!%p314_p2)   ;;  %vm475_vm2 = vcmask (!%p314_p2), 1040384   ;;  %v886_v38 = vld [vmem:[%s1061_s8 + $0x10] sm:$0xff] (!%p314_p2)   ;;  %vm632_vm3 = vcmask (!%p314_p2), 523264  }
   0x7   : > { %828 = vmatpush3.bf16.msra.mxu0 (!%p314_p2), %v878_v0  ;;  %831 = vmatprep.mubr.msk.bf16.mxu0 (!%p314_p2), %vm903_vm0, %v902_v1  ;;  %v884_v21 = vld [vmem:[%s1061_s8] sm:$0xff] (!%p314_p2)   ;;  %v885_v22 = vld [vmem:[%s1061_s8 + $0x8] sm:$0xff] (!%p314_p2)   ;;  %v887_v39 = vld [vmem:[%s1061_s8 + $0x18] sm:$0xff] (!%p314_p2)   ;;  %s904_s26 = smov (!%p314_p2), 64  }
   0x8   : > { %829 = vmatprep.subr.bf16.mxu0 (!%p314_p2), %v902_v1  ;;  %839 = vmatprep.mubr.msk.bf16.mxu1 (!%p314_p2), %vm903_vm0, %v902_v1  ;;  %v797_v27 = vld [vmem:[%s1057_s4] ss:$0 sm:$0xff] (!%p314_p2)  ;;  %v798_v29 = vld [vmem:[%s1057_s4 + $0x1] ss:$0 sm:$0xff] (!%p314_p2)  ;;  %v883_v36 = vld [vmem:[%s1059_s6 + $0x8] sm:$0xff] (!%p314_p2)  }
   0x9   : > { %836 = vmatpush3.bf16.msra.mxu1 (!%p314_p2), %v880_v19  ;;  %v882_v34 = vld [vmem:[%s1059_s6] sm:$0xff] (!%p314_p2)  }
   0xa   : > { %837 = vmatprep.subr.bf16.mxu1 (!%p314_p2), %v902_v1 }
   0xb   : > { %830 = vmatpush3.bf16.msra.mxu0 (!%p314_p2), %v879_v2 }
   0xc   : > { %851 = vmatprep.subr.bf16.mxu0 (!%p314_p2), %v902_v1 }
   0xd   : > { %s1064_s10 = smov (!%p359_p3, %s784_s10), 1  ;;  %838 = vmatpush3.bf16.msra.mxu1 %v881_v20 }
   0xe   : > { %s976_s15 = sshll.u32 %s1064_s10, 3  ;;  %843 = vmatprep.subr.bf16.mxu1 %v902_v1 }
   0xf   : > { %s366_s18 = scalar_lea.vmem %s1054_s1, %s976_s15  ;;  %s370_s21 = scalar_lea.vmem %s1055_s2, %s976_s15 }
  0x10   : > { %v380_v3 = vld [vmem:[%s366_s18] sm:$0xff]  ;;  %s362_s24 = scalar_lea.vmem %s1053_s0, %s976_s15  ;;  %s374_s29 = scalar_lea.vmem %s1056_s3, %s976_s15 }
  0x11   : > { %v381_v4 = vld [vmem:[%s370_s21] sm:$0xff]  ;;  %s378_s12 = scalar_lea.vmem %s1062_s9, %s976_s15 }
  0x12   : > { %v382_v5 = vmul.f32 %v381_v4, %v380_v3  ;;  %v444_v7 = vld [vmem:[%s362_s24] sm:$0xff] }
  0x13   : > { %v692_v57 = vld [vmem:[%s374_s29] sm:$0xff] }
  0x14   : > { %v383_v6 = vpack.c.bf16 %v382_v5, %v382_v5 }
  0x16   : > { %832 = vmatmul.mubr.msk.bf16.vlgmr.msra.gmra.mrb[0].mxu0 %vm400_vm1, %v383_v6 }
  0x17   : > { %859 = vmatprep.mubr.msk.bf16.mxu0 %vm903_vm0, %v902_v1  ;;  %852 = vmatpush3.bf16.msra.mxu0 %v884_v21 }
  0x18   : > { %853 = vmatprep.subr.bf16.mxu0 %v902_v1 }
  0x1b   : > { %854 = vmatpush3.bf16.msra.mxu0 %v885_v22 }
  0x1c   : > { %855 = vmatprep.subr.bf16.mxu0 %v902_v1 }
  0x1f   : > { %856 = vmatpush3.bf16.msra.mxu0 %v886_v38 }
  0x20   : > { %857 = vmatprep.subr.bf16.mxu0 %v902_v1 }
  0x23   : > { %858 = vmatpush3.bf16.msra.mxu0 %v887_v39 }
  0xe9   : > { %v438_v8 = vpop.f32.mrb[0].mxu0 }
  0xea   : > { %v994_v9 = vadd.f32 %v444_v7, %v438_v8  ;;  %v833_v10 = vpop.f32.mrb[1].mxu0 }
  0xeb   : > { %v441_v11 = vpop.f32.mrb[2].mxu0 }
  0xec   : > { %v834_v12 = vpop.f32.mrb[3].mxu0  ;;  %v448_v13 = vsel %vm400_vm1, %v994_v9, 0.0 }
  0xed   : > { %449 = vadd.xlane.f32.xlu0 %v448_v13 }
 0x17a   : > { %v450_v14 = vpop.xlane.xlu0 %449 }
 0x17b   : > { %v452_v15 = vmul.f32 0.03125, %v450_v14 }
 0x17d   : > { %v453_v16 = vsub.f32 %v994_v9, %v452_v15 }
 0x17f   : > { %v454_v17 = vmul.f32 %v453_v16, %v453_v16 }
 0x181   : > { %v455_v18 = vsel %vm400_vm1, %v454_v17, 0.0 }
 0x182   : > { %456 = vadd.xlane.f32.xlu0 %v455_v18 }
 0x20f   : > { %v457_v23 = vpop.xlane.xlu0 %456 }
 0x210   : > { %v458_v24 = vmul.f32 0.03125, %v457_v23 }
 0x212   : > { %v459_v25 = vadd.f32 1e-05, %v458_v24 }
 0x214   : > { %888 = vrsqrt.f32 %v459_v25 }
 0x21e   : > { %v889_v26 = vpop.eup %888 }
 0x21f   : > { %v461_v28 = vmul.f32 %v889_v26, %v453_v16 }
 0x221   : > { %v466_v30 = vmul.f32 %v797_v27, %v461_v28 }
 0x223   : > { %v471_v31 = vadd.f32 %v798_v29, %v466_v30 }
 0x225   : > { %v473_v32 = vrot.slane %v471_v31, 7  ;;  %v477_v37 = vpack.c.bf16 %v471_v31, %v471_v31 }
 0x227   : > { %v476_v33 = vsel %vm475_vm2, 0.0, %v473_v32 }
 0x228   : > { %v482_v35 = vpack.c.bf16 %v476_v33, %v476_v33 }
 0x22a   : > { %840 = vmatmul.mubr.msk.bf16.vlgmr.msra.gmra.mrb[0].mxu1 %vm400_vm1, %v482_v35 }
 0x22b   : > { %844 = vmatpush3.bf16.msra.mxu1 %v882_v34  ;;  %847 = vmatprep.mubr.msk.bf16.mxu1 %vm903_vm0, %v902_v1 }
 0x22c   : > { %845 = vmatprep.subr.bf16.mxu1 %v902_v1 }
 0x22f   : > { %846 = vmatpush3.bf16.msra.mxu1 %v883_v36 }
 0x236   : > { %848 = vmatmul.mubr.msk.bf16.vlgmr.msra.gmra.mrb[0].mxu1 %vm400_vm1, %v477_v37 }
 0x309   : > { %v591_v40 = vpop.f32.mrb[0].mxu1 }
 0x30a   : > { %v597_v41 = vmax.f32 %v591_v40, 0.0  ;;  %v849_v42 = vpop.f32.mrb[1].mxu1  ;;  %v810_v51 = vmul.f32 -1.442695, %v591_v40 }
 0x30b   : > { %v594_v43 = vpop.f32.mrb[2].mxu1 }
 0x30c   : > { %v598_v44 = vmul.f32 %v597_v41, %v597_v41  ;;  %v850_v45 = vpop.f32.mrb[3].mxu1  ;;  %890 = vpow2.f32 %v810_v51 }
 0x30e   : > { %v599_v46 = vpack.c.bf16 %v598_v44, %v598_v44 }
 0x310   : > { %860 = vmatmul.mubr.msk.bf16.vlgmr.msra.gmra.mrb[4].mxu0 %vm632_vm3, %v599_v46 }
 0x316   : > { %v891_v52 = vpop.eup %890 }
 0x317   : > { %v679_v53 = vadd.f32 1.0, %v891_v52 }
 0x319   : > { %892 = vrcp.f32 %v679_v53 }
 0x323   : > { %v893_v54 = vpop.eup %892 }
 0x3e3   : > { %v670_v47 = vpop.f32.mrb[4].mxu0 }
 0x3e4   : > { %683 = vrot.lane.b32.xlu1 %v670_v47, %s904_s26  ;;  %v861_v48 = vpop.f32.mrb[5].mxu0 }
 0x3e5   : > { %v673_v49 = vpop.f32.mrb[6].mxu0 }
 0x3e6   : > { %v862_v50 = vpop.f32.mrb[7].mxu0 }
 0x456   : > { %v684_v55 = vpop.permute.xlu1 %683 }
 0x457   : > { %v686_v56 = vmul.f32 %v893_v54, %v684_v55 }
 0x459   : > { %688 = vrot.lane.b32.xlu1 %v686_v56, %s904_s26 }
 0x4cb   : > { %v689_v58 = vpop.permute.xlu1 %688 }
 0x4cc   : > { %v691_v59 = vadd.f32 %v689_v58, %v994_v9 }
 0x4ce   : > { %v693_v60 = vadd.f32 %v692_v57, %v691_v59 }
 0x4d0   : > { %694 = vst.msk [vmem:[%s378_s12] sm:$0xff] %vm400_vm1, %v693_v60 }
 0x4d1 PF: > { %s19_s30 = sadd.s32 1, %s900_s30  }
 0x4d2   : > { %p16_p4 = scmp.ge.s32.totalorder %s19_s30, 4  }
 0x4d4   :  { %18 = sbr.rel (!%p16_p4) target bundleno = 1 (0x1), region = 95 }

// kernel: point_rwkv_forward.15
= control target key start
LH: loop header
LB: loop body
LE: loop exit
PB: predicated region body
PF: predicated region fallthrough
CT: control target
= control target key end

     0   :  { %vm20_vm0 = vcmask 261120   ;;  %s251_s0 = inlined_call_operand.vmem [shape: f32[16,32], index: 0, kind: input, shape index: {}]   ;;  %s252_s1 = inlined_call_operand.vmem [shape: f32[2,32], index: 1, kind: input, shape index: {}]   ;;  %s253_s2 = inlined_call_operand.vmem [shape: bf16[32,64], index: 2, kind: input, shape index: {}]   ;;  %s254_s3 = inlined_call_operand.hbm [shape: f32[16,64], index: 3, kind: output, shape index: {}]  }
   0x1   :  { %v16_v0 = vld [vmem:[%s251_s0] sm:$0xff]  ;;  %v17_v1 = vld [vmem:[%s251_s0 + $0x8] sm:$0xff] }
   0x2   :  { %v21_v2 = vsel %vm20_vm0, %v16_v0, 0.0 }
   0x3   :  { %22 = vadd.xlane.f32.xlu0 %v21_v2 }
   0x4   :  { %8 = vsyncpa [#allocation3], 0  ;;  %v24_v3 = vsel %vm20_vm0, %v17_v1, 0.0  ;;  %v161_v14 = vld [vmem:[%s253_s2] sm:$0xff]   ;;  %v191_v15 = vmov 0.0   ;;  %v162_v16 = vld [vmem:[%s253_s2 + $0x8] sm:$0xff]  }
   0x5   :  { %148 = vmatprep.subr.bf16.mxu0 %v191_v15  ;;  %vm192_vm1 = vmmov 0   ;;  %v140_v25 = vld [vmem:[%s252_s1] ss:$0 sm:$0xff]  ;;  %v141_v29 = vld [vmem:[%s252_s1 + $0x1] ss:$0 sm:$0xff]  ;;  %s193_s22 = smov [#allocation2]  }
   0x6   :  { %149 = vmatpush3.bf16.msra.mxu0 %v161_v14  ;;  %152 = vmatprep.mubr.msk.bf16.mxu0 %vm192_vm1, %v191_v15  ;;  %s129_s23 = sshll.u32 %s193_s22, 4  ;;  %vm121_vm2 = vcmask 523264   ;;  %s130_s23 = int_to_ptr.vmem [resolvable:$true] %s129_s23 }
   0x7   :  { %25 = vadd.xlane.f32.xlu0 %v24_v3  ;;  %150 = vmatprep.subr.bf16.mxu0 %v191_v15  ;;  %s167_s24 = scalar_lea.vmem %s130_s23, 256  ;;  %p172_p1 = scmp.lt.s32.totalorder %s130_s23, %s130_s23 }
   0x8   :  { %p168_p0 = scmp.ne.s32.totalorder %s130_s23, %s167_s24  ;;  %p173_p2 = scmp.lt.s32.totalorder %s167_s24, %s167_s24 }
   0xa   :  { %151 = vmatpush3.bf16.msra.mxu0 %v162_v16  ;;  %p174_p3 = por %p173_p2, %p172_p1 }
   0xc   :  { %p175_p4 = pnand %p174_p3, %p168_p0 }
  0x90   :  { %v23_v4 = vpop.xlane.xlu0 %22 }
  0x91   :  { %v28_v5 = vmul.f32 0.03125, %v23_v4 }
  0x93   :  { %v30_v6 = vsub.f32 %v16_v0, %v28_v5 }
  0x94   :  { %v26_v7 = vpop.xlane.xlu0 %25 }
  0x95   :  { %v29_v8 = vmul.f32 0.03125, %v26_v7  ;;  %v32_v9 = vmul.f32 %v30_v6, %v30_v6 }
  0x97   :  { %v31_v10 = vsub.f32 %v17_v1, %v29_v8  ;;  %v34_v11 = vsel %vm20_vm0, %v32_v9, 0.0 }
  0x98   :  { %35 = vadd.xlane.f32.xlu1 %v34_v11 }
  0x99   :  { %v33_v12 = vmul.f32 %v31_v10, %v31_v10 }
  0x9b   :  { %v37_v13 = vsel %vm20_vm0, %v33_v12, 0.0 }
  0x9c   :  { %38 = vadd.xlane.f32.xlu1 %v37_v13 }
 0x125   :  { %v36_v17 = vpop.xlane.xlu1 %35 }
 0x126   :  { %v40_v18 = vmul.f32 0.03125, %v36_v17 }
 0x128   :  { %v42_v19 = vadd.f32 1e-05, %v40_v18 }
 0x129   :  { %v39_v20 = vpop.xlane.xlu1 %38 }
 0x12a   :  { %163 = vrsqrt.f32 %v42_v19  ;;  %v41_v21 = vmul.f32 0.03125, %v39_v20 }
 0x12c   :  { %v43_v22 = vadd.f32 1e-05, %v41_v21 }
 0x12e   :  { %165 = vrsqrt.f32 %v43_v22 }
 0x134   :  { %v164_v23 = vpop.eup %163 }
 0x135   :  { %v46_v24 = vmul.f32 %v164_v23, %v30_v6 }
 0x137   :  { %v52_v28 = vmul.f32 %v140_v25, %v46_v24 }
 0x138   :  { %v166_v26 = vpop.eup %165 }
 0x139   :  { %v47_v27 = vmul.f32 %v166_v26, %v31_v10  ;;  %v58_v31 = vadd.f32 %v141_v29, %v52_v28 }
 0x13b   :  { %v53_v30 = vmul.f32 %v140_v25, %v47_v27 }
 0x13d   :  { %v59_v32 = vadd.f32 %v141_v29, %v53_v30 }
 0x13f   :  { %v60_v33 = vpack.c.bf16 %v59_v32, %v58_v31 }
 0x141   :  { %153 = vmatmul.mubr.msk.bf16.vlgmr.msra.gmra.mrb[0].mxu0 %vm20_vm0, %v60_v33 }
 0x214   :  { %v114_v34 = vpop.f32.mrb[0].mxu0 }
 0x215   :  { %122 = vst.msk [vmem:[#allocation2] sm:$0xff] %vm121_vm2, %v114_v34  ;;  %v154_v35 = vpop.f32.mrb[1].mxu0 }
 0x216   :  { %v117_v36 = vpop.f32.mrb[2].mxu0 }
 0x217   :  { %123 = vst.msk [vmem:[#allocation2 + $0x8] sm:$0xff] %vm121_vm2, %v117_v36  ;;  %v155_v37 = vpop.f32.mrb[3].mxu0 }
 0x218   :  { %178 = shalt.err (!%p175_p4)
}
 0x219   :  { %s179_s26 = scalar_lea.hbm %s254_s3, 256 }
 0x21a   :  { %p180_p5 = scmp.ne.s32.totalorder %s254_s3, %s179_s26  ;;  %p183_p6 = scmp.lt.u32.totalorder %s179_s26, %s254_s3 }
 0x21c   :  { %p185_p7 = pnand %p183_p6, %p180_p5 }
 0x21e   :  { %188 = shalt.err (!%p185_p7)
}
 0x21f   :  { %s194_s4 = smov 128   ;;  %s195_s5 = smov 8  }
 0x220   :  { %135 = dma.vmem_to_hbm [thread:$0]  %s130_s23, 256, %s254_s3, [#allocation3], %s194_s4, %s194_s4, %s195_s5  }
 0x221   :  { %189 = dma.done.wait [#allocation3], 256  }
 0x222   :  { %190 = vsyncadd [#allocation3], 4294967040 }
 0x223   :  { %139 = vsyncpa [#allocation3], 1 }

</bundles_post_ra>
